<compile_context>
chip_gen: v7x
topology: tpu7x:2x2x1
jax: 0.10.0
libtpu: 0.0.40
codegen_flags: <defaults>
</compile_context>

<pallas_src>
import functools
import math

import jax
import jax.numpy as jnp
from jax.experimental import pallas as pl
from jax.experimental.pallas import tpu as pltpu

# ---------------- small synthetic mBERT config ----------------
VOCAB = 119          # stand-in for bert-base-multilingual-cased's 119547
HIDDEN = 32
NUM_LAYERS = 2
NUM_HEADS = 4
HEAD_DIM = HIDDEN // NUM_HEADS
INTERMEDIATE = 64
MAX_POS = 32
TYPE_VOCAB = 2
LN_EPS = 1e-12
DROPOUT_P = 0.4      # torch.nn.Dropout(0.4) applied to the pooled output
ATTN_SCALE = 1.0 / math.sqrt(HEAD_DIM)


def _layernorm(x, g, b):
    mean = jnp.mean(x, axis=-1, keepdims=True)
    var = jnp.mean(jnp.square(x - mean), axis=-1, keepdims=True)
    return (x - mean) * jax.lax.rsqrt(var + LN_EPS) * g + b


def _gelu(x):
    # TODO(synk): HF BERT uses erf-based GELU; tanh approximation used here
    # (keeps the transcendental on the EUP, matches to ~1e-3).
    return 0.5 * x * (1.0 + jnp.tanh(0.7978845608028654 * (x + 0.044715 * (x * x * x))))


# ======================= fused Pallas kernel =======================

def _mbert_fused_kernel(x_ref, mask_ref, drop_ref,       # [B*S,H], [B,S], [B,H]
                        emb_g_ref, emb_b_ref,             # [1, H]
                        qkv_w_ref, qkv_b_ref,             # [L, H, 3H], [L, 1, 3H]
                        ao_w_ref, ao_b_ref,               # [L, H, H], [L, 1, H]
                        aln_g_ref, aln_b_ref,             # [L, 1, H]
                        i_w_ref, i_b_ref,                 # [L, H, I], [L, 1, I]
                        o_w_ref, o_b_ref,                 # [L, I, H], [L, 1, H]
                        oln_g_ref, oln_b_ref,             # [L, 1, H]
                        pool_w_ref, pool_b_ref,           # [H, H], [1, H]
                        out_ref,                          # [B, H]
                        *, batch, seq):
    H, HD, NH = HIDDEN, HEAD_DIM, NUM_HEADS

    # -------- embedding LayerNorm --------
    x = _layernorm(x_ref[...], emb_g_ref[...], emb_b_ref[...])            # [B*S, H]

    # additive attention mask on the VPU; head-major batched copy so that row
    # h*B + b of the stacked attention batch sees mask row b.
    add_mask = (1.0 - mask_ref[...]) * -10000.0                           # [B, S]
    add_mask_hb = jnp.tile(add_mask, (NH, 1))[:, None, :]                 # [NH*B, 1, S]

    for l in range(NUM_LAYERS):
        # -------- fused Q/K/V projection: one [H, 3H] matmul --------
        qkv = (jnp.dot(x, qkv_w_ref[l], preferred_element_type=jnp.float32)
               + qkv_b_ref[l])                                            # [B*S, 3H]

        # -------- multi-head self-attention, batched over (head, batch) ------
        def stack_heads(base):
            # One lane slice per head (not per (batch, head)); rows split into
            # (B, S) and heads stacked on the leading axis -> [NH*B, S, HD].
            return jnp.concatenate(
                [qkv[:, base + h * HD: base + (h + 1) * HD].reshape(batch, seq, HD)
                 for h in range(NH)], axis=0)

        qh = stack_heads(0)
        kh = stack_heads(H)
        vh = stack_heads(2 * H)

        # batched contraction over the last dims (no .T / XLU transpose)
        s = jnp.einsum("bqd,bkd->bqk", qh, kh,
                       preferred_element_type=jnp.float32)
        s = s * ATTN_SCALE + add_mask_hb
        s = s - jnp.max(s, axis=-1, keepdims=True)
        p = jnp.exp(s)
        # TODO(synk): on real TPU use pl.reciprocal(sum, approx=True) (EUP slot);
        # kept as a divide here so the kernel also lowers in CPU interpret mode.
        p = p / jnp.sum(p, axis=-1, keepdims=True)
        ctxh = jnp.einsum("bqk,bkd->bqd", p, vh,
                          preferred_element_type=jnp.float32)             # [NH*B, S, HD]

        # merge heads in registers (lane-axis concat) -> no VMEM scratch,
        # no masked 8x8 partial stores, no reload.
        ctx = jnp.concatenate(
            [ctxh[h * batch:(h + 1) * batch].reshape(batch * seq, HD)
             for h in range(NH)], axis=-1)                                # [B*S, H]

        # -------- attention output dense + residual + LN --------
        attn_out = (jnp.dot(ctx, ao_w_ref[l], preferred_element_type=jnp.float32)
                    + ao_b_ref[l])
        h1 = _layernorm(attn_out + x, aln_g_ref[l], aln_b_ref[l])

        # -------- FFN (GELU) + residual + LN --------
        inter = _gelu(jnp.dot(h1, i_w_ref[l], preferred_element_type=jnp.float32)
                      + i_b_ref[l])
        ffn = (jnp.dot(inter, o_w_ref[l], preferred_element_type=jnp.float32)
               + o_b_ref[l])
        x = _layernorm(ffn + h1, oln_g_ref[l], oln_b_ref[l])

    # -------- BertPooler: tanh dense on the CLS token (in-register gather) ----
    cls = x.reshape(batch, seq, H)[:, 0, :]                               # [B, H]
    pooled = jnp.tanh(jnp.dot(cls, pool_w_ref[...],
                              preferred_element_type=jnp.float32) + pool_b_ref[...])

    # -------- Dropout(0.4): pre-scaled keep mask (all-ones in eval) --------
    out_ref[...] = (pooled * drop_ref[...]).astype(out_ref.dtype)


def mbert_pallas(params, emb_sum, attn_mask_f32, drop_mask):
    B, S = attn_mask_f32.shape
    kernel = functools.partial(_mbert_fused_kernel, batch=B, seq=S)
    vmem = pl.BlockSpec(memory_space=pltpu.MemorySpace.VMEM)
    return pl.pallas_call(
        kernel,
        out_shape=jax.ShapeDtypeStruct((B, HIDDEN), jnp.float32),
        in_specs=[vmem] * 19,
        out_specs=vmem,
    )(
        emb_sum, attn_mask_f32, drop_mask,
        params["emb_ln_g"], params["emb_ln_b"],
        params["qkv_w"], params["qkv_b"],
        params["ao_w"], params["ao_b"],
        params["attn_ln_g"], params["attn_ln_b"],
        params["i_w"], params["i_b"],
        params["o_w"], params["o_b"],
        params["out_ln_g"], params["out_ln_b"],
        params["pool_w"], params["pool_b"],
    )


# =============== pure-JAX reference (for verification) ===============

def mbert_ref(params, emb_sum, attn_mask_f32):
    B, S = attn_mask_f32.shape
    x = _layernorm(emb_sum, params["emb_ln_g"], params["emb_ln_b"])
    add_mask = (1.0 - attn_mask_f32) * -10000.0
    for l in range(NUM_LAYERS):
        qkv = x @ params["qkv_w"][l] + params["qkv_b"][l]
        q, k, v = qkv[:, :HIDDEN], qkv[:, HIDDEN:2 * HIDDEN], qkv[:, 2 * HIDDEN:]

        def split(t):
            return t.reshape(B, S, NUM_HEADS, HEAD_DIM).transpose(0, 2, 1, 3)

        s = (jnp.einsum("bhqd,bhkd->bhqk", split(q), split(k)) * ATTN_SCALE
             + add_mask[:, None, None, :])
        p = jax.nn.softmax(s, axis=-1)
        ctx = (jnp.einsum("bhqk,bhkd->bhqd", p, split(v))
               .transpose(0, 2, 1, 3).reshape(B * S, HIDDEN))
        attn_out = ctx @ params["ao_w"][l] + params["ao_b"][l]
        h1 = _layernorm(attn_out + x, params["attn_ln_g"][l], params["attn_ln_b"][l])
        inter = _gelu(h1 @ params["i_w"][l] + params["i_b"][l])
        ffn = inter @ params["o_w"][l] + params["o_b"][l]
        x = _layernorm(ffn + h1, params["out_ln_g"][l], params["out_ln_b"][l])
    cls = x.reshape(B, S, HIDDEN)[:, 0, :]
    return jnp.tanh(cls @ params["pool_w"] + params["pool_b"])


# ======================= model glue =======================

def init_params(key):
    keys = iter(jax.random.split(key, 64))

    def w(shape):
        return 0.02 * jax.random.normal(next(keys), shape, dtype=jnp.float32)

    L, H, I = NUM_LAYERS, HIDDEN, INTERMEDIATE
    return {
        "word_emb": w((VOCAB, H)),
        "pos_emb": w((MAX_POS, H)),
        "type_emb": w((TYPE_VOCAB, H)),
        "emb_ln_g": jnp.ones((1, H), jnp.float32),
        "emb_ln_b": jnp.zeros((1, H), jnp.float32),
        # per-layer weights stacked on a leading layer axis; Q/K/V concatenated.
        "qkv_w": w((L, H, 3 * H)),
        "qkv_b": jnp.zeros((L, 1, 3 * H), jnp.float32),
        "ao_w": w((L, H, H)),
        "ao_b": jnp.zeros((L, 1, H), jnp.float32),
        "attn_ln_g": jnp.ones((L, 1, H), jnp.float32),
        "attn_ln_b": jnp.zeros((L, 1, H), jnp.float32),
        "i_w": w((L, H, I)),
        "i_b": jnp.zeros((L, 1, I), jnp.float32),
        "o_w": w((L, I, H)),
        "o_b": jnp.zeros((L, 1, H), jnp.float32),
        "out_ln_g": jnp.ones((L, 1, H), jnp.float32),
        "out_ln_b": jnp.zeros((L, 1, H), jnp.float32),
        "pool_w": w((H, H)),
        "pool_b": jnp.zeros((1, H), jnp.float32),
    }


def _dropout_mask(seed, batch, training):
    # TODO(synk): torch's dropout RNG stream cannot be matched; in-kernel
    # pltpu.prng_* has no CPU/interpret lowering, so the pre-scaled keep mask is
    # generated host-side and fused into the kernel epilogue as one multiply.
    if not training:
        return jnp.ones((batch, HIDDEN), jnp.float32)
    keep = jax.random.bernoulli(jax.random.PRNGKey(seed),
                                1.0 - DROPOUT_P, (batch, HIDDEN))
    return keep.astype(jnp.float32) * (1.0 / (1.0 - DROPOUT_P))


def mbert_forward(params, ids, attention_mask, token_type_ids,
                  use_pallas=True, training=False, dropout_seed=0):
    B, S = ids.shape
    # TODO(synk): nn.Embedding gathers (word/pos/type) stay in plain JAX — no clean
    # small Pallas equivalent without a manual DMA gather at this size.
    emb_sum = (params["word_emb"][ids]
               + params["pos_emb"][jnp.arange(S)][None, :, :]
               + params["type_emb"][token_type_ids]).reshape(B * S, HIDDEN)
    mask_f32 = attention_mask.astype(jnp.float32)
    drop_mask = _dropout_mask(dropout_seed, B, training)
    if use_pallas:
        return mbert_pallas(params, emb_sum, mask_f32, drop_mask)
    return mbert_ref(params, emb_sum, mask_f32) * drop_mask


if __name__ == "__main__":
    key = jax.random.PRNGKey(0)
    pkey, ikey = jax.random.split(key)
    params = init_params(pkey)

    B, S = 2, 8
    ids = jax.random.randint(ikey, (B, S), 0, VOCAB, dtype=jnp.int32)
    attention_mask = jnp.ones((B, S), jnp.int32).at[1, 6:].set(0)   # pad tail of row 1
    token_type_ids = jnp.zeros((B, S), jnp.int32).at[:, S // 2:].set(1)

    # ----- eval mode (Dropout is identity) -----
    out = jax.block_until_ready(
        mbert_forward(params, ids, attention_mask, token_type_ids, use_pallas=True))
    ref = jax.block_until_ready(
        mbert_forward(params, ids, attention_mask, token_type_ids, use_pallas=False))
    assert out.shape == (B, HIDDEN), out.shape
    assert jnp.allclose(out, ref, atol=3e-4, rtol=3e-4), float(jnp.max(jnp.abs(out - ref)))

    # ----- training mode: deterministic host-generated Dropout(0.4) mask -----
    out_tr = jax.block_until_ready(
        mbert_forward(params, ids, attention_mask, token_type_ids,
                      use_pallas=True, training=True, dropout_seed=123))
    ref_tr = jax.block_until_ready(
        mbert_forward(params, ids, attention_mask, token_type_ids,
                      use_pallas=False, training=True, dropout_seed=123))
    assert out_tr.shape == (B, HIDDEN)
    assert bool(jnp.all(jnp.isfinite(out_tr)))
    assert jnp.allclose(out_tr, ref_tr, atol=3e-4, rtol=3e-4), \
        float(jnp.max(jnp.abs(out_tr - ref_tr)))

    print("KERNEL_OK")
</pallas_src>

<mosaic_0001>
module attributes {stable_mosaic.version = 11 : i64} {
  func.func @_mbert_fused_kernel(%arg0: memref<16x32xf32, #tpu.memory_space<vmem>>, %arg1: memref<2x8xf32, #tpu.memory_space<vmem>>, %arg2: memref<2x32xf32, #tpu.memory_space<vmem>>, %arg3: memref<1x32xf32, #tpu.memory_space<vmem>>, %arg4: memref<1x32xf32, #tpu.memory_space<vmem>>, %arg5: memref<2x32x96xf32, #tpu.memory_space<vmem>>, %arg6: memref<2x1x96xf32, #tpu.memory_space<vmem>>, %arg7: memref<2x32x32xf32, #tpu.memory_space<vmem>>, %arg8: memref<2x1x32xf32, #tpu.memory_space<vmem>>, %arg9: memref<2x1x32xf32, #tpu.memory_space<vmem>>, %arg10: memref<2x1x32xf32, #tpu.memory_space<vmem>>, %arg11: memref<2x32x64xf32, #tpu.memory_space<vmem>>, %arg12: memref<2x1x64xf32, #tpu.memory_space<vmem>>, %arg13: memref<2x64x32xf32, #tpu.memory_space<vmem>>, %arg14: memref<2x1x32xf32, #tpu.memory_space<vmem>>, %arg15: memref<2x1x32xf32, #tpu.memory_space<vmem>>, %arg16: memref<2x1x32xf32, #tpu.memory_space<vmem>>, %arg17: memref<32x32xf32, #tpu.memory_space<vmem>>, %arg18: memref<1x32xf32, #tpu.memory_space<vmem>>, %arg19: memref<2x32xf32, #tpu.memory_space<vmem>>) attributes {dimension_semantics = [], scalar_prefetch = 0 : i64, scratch_operands = 0 : i64, tpu.core_type = #tpu.core_type<tc>} {
    %c0 = arith.constant 0 : index
    %c0_0 = arith.constant 0 : index
    %0 = vector.load %arg0[%c0, %c0_0] : memref<16x32xf32, #tpu.memory_space<vmem>>, vector<16x32xf32>
    %c0_1 = arith.constant 0 : index
    %c0_2 = arith.constant 0 : index
    %1 = vector.load %arg3[%c0_1, %c0_2] : memref<1x32xf32, #tpu.memory_space<vmem>>, vector<1x32xf32>
    %c0_3 = arith.constant 0 : index
    %c0_4 = arith.constant 0 : index
    %2 = vector.load %arg4[%c0_3, %c0_4] : memref<1x32xf32, #tpu.memory_space<vmem>>, vector<1x32xf32>
    %cst = arith.constant dense<0.000000e+00> : vector<16xf32>
    %3 = vector.multi_reduction <add>, %0, %cst [1] : vector<16x32xf32> to vector<16xf32>
    %4 = vector.shape_cast %3 : vector<16xf32> to vector<16x1xf32>
    %cst_5 = arith.constant 3.200000e+01 : f32
    %5 = vector.broadcast %cst_5 : f32 to vector<16x1xf32>
    %6 = arith.divf %4, %5 : vector<16x1xf32>
    %7 = vector.broadcast %6 : vector<16x1xf32> to vector<16x32xf32>
    %8 = arith.subf %0, %7 : vector<16x32xf32>
    %9 = arith.mulf %8, %8 : vector<16x32xf32>
    %cst_6 = arith.constant dense<0.000000e+00> : vector<16xf32>
    %10 = vector.multi_reduction <add>, %9, %cst_6 [1] : vector<16x32xf32> to vector<16xf32>
    %11 = vector.shape_cast %10 : vector<16xf32> to vector<16x1xf32>
    %cst_7 = arith.constant 3.200000e+01 : f32
    %12 = vector.broadcast %cst_7 : f32 to vector<16x1xf32>
    %13 = arith.divf %11, %12 : vector<16x1xf32>
    %14 = vector.broadcast %6 : vector<16x1xf32> to vector<16x32xf32>
    %15 = arith.subf %0, %14 : vector<16x32xf32>
    %cst_8 = arith.constant 9.99999996E-13 : f32
    %16 = vector.broadcast %cst_8 : f32 to vector<16x1xf32>
    %17 = arith.addf %13, %16 : vector<16x1xf32>
    %18 = math.rsqrt %17 : vector<16x1xf32>
    %19 = vector.broadcast %18 : vector<16x1xf32> to vector<16x32xf32>
    %20 = arith.mulf %15, %19 : vector<16x32xf32>
    %21 = vector.broadcast %1 : vector<1x32xf32> to vector<16x32xf32>
    %22 = arith.mulf %20, %21 : vector<16x32xf32>
    %23 = vector.broadcast %2 : vector<1x32xf32> to vector<16x32xf32>
    %24 = arith.addf %22, %23 : vector<16x32xf32>
    %c0_9 = arith.constant 0 : index
    %c0_10 = arith.constant 0 : index
    %25 = vector.load %arg1[%c0_9, %c0_10] : memref<2x8xf32, #tpu.memory_space<vmem>>, vector<2x8xf32>
    %cst_11 = arith.constant 1.000000e+00 : f32
    %26 = vector.broadcast %cst_11 : f32 to vector<2x8xf32>
    %27 = arith.subf %26, %25 : vector<2x8xf32>
    %cst_12 = arith.constant -1.000000e+04 : f32
    %28 = vector.broadcast %cst_12 : f32 to vector<2x8xf32>
    %29 = arith.mulf %27, %28 : vector<2x8xf32>
    %30 = tpu.concatenate %29, %29, %29, %29 in 0 : vector<2x8xf32>, vector<2x8xf32>, vector<2x8xf32>, vector<2x8xf32> -> vector<8x8xf32>
    %31 = vector.shape_cast %30 : vector<8x8xf32> to vector<8x1x8xf32>
    %c0_13 = arith.constant 0 : index
    %c0_14 = arith.constant 0 : index
    %c0_15 = arith.constant 0 : index
    %32 = vector.load %arg5[%c0_13, %c0_14, %c0_15] : memref<2x32x96xf32, #tpu.memory_space<vmem>>, vector<1x32x96xf32>
    %33 = vector.shape_cast %32 : vector<1x32x96xf32> to vector<32x96xf32>
    %cst_16 = arith.constant dense<0.000000e+00> : vector<16x96xf32>
    %34 = tpu.matmul %24, %33, %cst_16 {dimension_numbers = #tpu.dot_dimension_numbers<[1], [0], [0], [1], [0, 0, 1, 1], [], []>} : vector<16x32xf32>, vector<32x96xf32>, vector<16x96xf32> -> vector<16x96xf32>
    %c0_17 = arith.constant 0 : index
    %c0_18 = arith.constant 0 : index
    %c0_19 = arith.constant 0 : index
    %35 = vector.load %arg6[%c0_17, %c0_18, %c0_19] : memref<2x1x96xf32, #tpu.memory_space<vmem>>, vector<1x1x96xf32>
    %36 = vector.shape_cast %35 : vector<1x1x96xf32> to vector<1x96xf32>
    %37 = vector.broadcast %36 : vector<1x96xf32> to vector<16x96xf32>
    %38 = arith.addf %34, %37 : vector<16x96xf32>
    %39 = vector.extract_strided_slice %38 {offsets = [0, 0], sizes = [16, 8], strides = [1, 1]} : vector<16x96xf32> to vector<16x8xf32>
    %40 = vector.shape_cast %39 : vector<16x8xf32> to vector<2x8x8xf32>
    %41 = vector.extract_strided_slice %38 {offsets = [0, 8], sizes = [16, 8], strides = [1, 1]} : vector<16x96xf32> to vector<16x8xf32>
    %42 = vector.shape_cast %41 : vector<16x8xf32> to vector<2x8x8xf32>
    %43 = vector.extract_strided_slice %38 {offsets = [0, 16], sizes = [16, 8], strides = [1, 1]} : vector<16x96xf32> to vector<16x8xf32>
    %44 = vector.shape_cast %43 : vector<16x8xf32> to vector<2x8x8xf32>
    %45 = vector.extract_strided_slice %38 {offsets = [0, 24], sizes = [16, 8], strides = [1, 1]} : vector<16x96xf32> to vector<16x8xf32>
    %46 = vector.shape_cast %45 : vector<16x8xf32> to vector<2x8x8xf32>
    %47 = tpu.concatenate %40, %42, %44, %46 in 0 : vector<2x8x8xf32>, vector<2x8x8xf32>, vector<2x8x8xf32>, vector<2x8x8xf32> -> vector<8x8x8xf32>
    %48 = vector.extract_strided_slice %38 {offsets = [0, 32], sizes = [16, 8], strides = [1, 1]} : vector<16x96xf32> to vector<16x8xf32>
    %49 = vector.shape_cast %48 : vector<16x8xf32> to vector<2x8x8xf32>
    %50 = vector.extract_strided_slice %38 {offsets = [0, 40], sizes = [16, 8], strides = [1, 1]} : vector<16x96xf32> to vector<16x8xf32>
    %51 = vector.shape_cast %50 : vector<16x8xf32> to vector<2x8x8xf32>
    %52 = vector.extract_strided_slice %38 {offsets = [0, 48], sizes = [16, 8], strides = [1, 1]} : vector<16x96xf32> to vector<16x8xf32>
    %53 = vector.shape_cast %52 : vector<16x8xf32> to vector<2x8x8xf32>
    %54 = vector.extract_strided_slice %38 {offsets = [0, 56], sizes = [16, 8], strides = [1, 1]} : vector<16x96xf32> to vector<16x8xf32>
    %55 = vector.shape_cast %54 : vector<16x8xf32> to vector<2x8x8xf32>
    %56 = tpu.concatenate %49, %51, %53, %55 in 0 : vector<2x8x8xf32>, vector<2x8x8xf32>, vector<2x8x8xf32>, vector<2x8x8xf32> -> vector<8x8x8xf32>
    %57 = vector.extract_strided_slice %38 {offsets = [0, 64], sizes = [16, 8], strides = [1, 1]} : vector<16x96xf32> to vector<16x8xf32>
    %58 = vector.shape_cast %57 : vector<16x8xf32> to vector<2x8x8xf32>
    %59 = vector.extract_strided_slice %38 {offsets = [0, 72], sizes = [16, 8], strides = [1, 1]} : vector<16x96xf32> to vector<16x8xf32>
    %60 = vector.shape_cast %59 : vector<16x8xf32> to vector<2x8x8xf32>
    %61 = vector.extract_strided_slice %38 {offsets = [0, 80], sizes = [16, 8], strides = [1, 1]} : vector<16x96xf32> to vector<16x8xf32>
    %62 = vector.shape_cast %61 : vector<16x8xf32> to vector<2x8x8xf32>
    %63 = vector.extract_strided_slice %38 {offsets = [0, 88], sizes = [16, 8], strides = [1, 1]} : vector<16x96xf32> to vector<16x8xf32>
    %64 = vector.shape_cast %63 : vector<16x8xf32> to vector<2x8x8xf32>
    %65 = tpu.concatenate %58, %60, %62, %64 in 0 : vector<2x8x8xf32>, vector<2x8x8xf32>, vector<2x8x8xf32>, vector<2x8x8xf32> -> vector<8x8x8xf32>
    "tpu.trace_start"() <{level = 10 : i32, message = "bqd,bkd->bqk"}> : () -> ()
    %cst_20 = arith.constant dense<0.000000e+00> : vector<8x8x8xf32>
    %66 = tpu.matmul %47, %56, %cst_20 {dimension_numbers = #tpu.dot_dimension_numbers<[2], [2], [1], [1], [0, 0, 0, 1, 1, 1], [0], [0]>} : vector<8x8x8xf32>, vector<8x8x8xf32>, vector<8x8x8xf32> -> vector<8x8x8xf32>
    "tpu.trace_stop"() : () -> ()
    %cst_21 = arith.constant 0.353553385 : f32
    %67 = vector.broadcast %cst_21 : f32 to vector<8x8x8xf32>
    %68 = arith.mulf %66, %67 : vector<8x8x8xf32>
    %69 = vector.broadcast %31 : vector<8x1x8xf32> to vector<8x8x8xf32>
    %70 = arith.addf %68, %69 : vector<8x8x8xf32>
    %cst_22 = arith.constant dense<0xFF800000> : vector<8x8xf32>
    %71 = vector.multi_reduction <maximumf>, %70, %cst_22 [2] : vector<8x8x8xf32> to vector<8x8xf32>
    %72 = vector.shape_cast %71 : vector<8x8xf32> to vector<8x8x1xf32>
    %73 = vector.broadcast %72 : vector<8x8x1xf32> to vector<8x8x8xf32>
    %74 = arith.subf %70, %73 : vector<8x8x8xf32>
    %75 = math.exp %74 : vector<8x8x8xf32>
    %cst_23 = arith.constant dense<0.000000e+00> : vector<8x8xf32>
    %76 = vector.multi_reduction <add>, %75, %cst_23 [2] : vector<8x8x8xf32> to vector<8x8xf32>
    %77 = vector.shape_cast %76 : vector<8x8xf32> to vector<8x8x1xf32>
    %78 = vector.broadcast %77 : vector<8x8x1xf32> to vector<8x8x8xf32>
    %79 = arith.divf %75, %78 : vector<8x8x8xf32>
    "tpu.trace_start"() <{level = 10 : i32, message = "bqk,bkd->bqd"}> : () -> ()
    %cst_24 = arith.constant dense<0.000000e+00> : vector<8x8x8xf32>
    %80 = tpu.matmul %79, %65, %cst_24 {dimension_numbers = #tpu.dot_dimension_numbers<[2], [1], [1], [2], [0, 0, 0, 1, 1, 2], [0], [0]>} : vector<8x8x8xf32>, vector<8x8x8xf32>, vector<8x8x8xf32> -> vector<8x8x8xf32>
    "tpu.trace_stop"() : () -> ()
    %81 = vector.extract_strided_slice %80 {offsets = [0, 0, 0], sizes = [2, 8, 8], strides = [1, 1, 1]} : vector<8x8x8xf32> to vector<2x8x8xf32>
    %82 = vector.shape_cast %81 : vector<2x8x8xf32> to vector<16x8xf32>
    %83 = vector.extract_strided_slice %80 {offsets = [2, 0, 0], sizes = [2, 8, 8], strides = [1, 1, 1]} : vector<8x8x8xf32> to vector<2x8x8xf32>
    %84 = vector.shape_cast %83 : vector<2x8x8xf32> to vector<16x8xf32>
    %85 = vector.extract_strided_slice %80 {offsets = [4, 0, 0], sizes = [2, 8, 8], strides = [1, 1, 1]} : vector<8x8x8xf32> to vector<2x8x8xf32>
    %86 = vector.shape_cast %85 : vector<2x8x8xf32> to vector<16x8xf32>
    %87 = vector.extract_strided_slice %80 {offsets = [6, 0, 0], sizes = [2, 8, 8], strides = [1, 1, 1]} : vector<8x8x8xf32> to vector<2x8x8xf32>
    %88 = vector.shape_cast %87 : vector<2x8x8xf32> to vector<16x8xf32>
    %89 = tpu.concatenate %82, %84, %86, %88 in 1 : vector<16x8xf32>, vector<16x8xf32>, vector<16x8xf32>, vector<16x8xf32> -> vector<16x32xf32>
    %c0_25 = arith.constant 0 : index
    %c0_26 = arith.constant 0 : index
    %c0_27 = arith.constant 0 : index
    %90 = vector.load %arg7[%c0_25, %c0_26, %c0_27] : memref<2x32x32xf32, #tpu.memory_space<vmem>>, vector<1x32x32xf32>
    %91 = vector.shape_cast %90 : vector<1x32x32xf32> to vector<32x32xf32>
    %cst_28 = arith.constant dense<0.000000e+00> : vector<16x32xf32>
    %92 = tpu.matmul %89, %91, %cst_28 {dimension_numbers = #tpu.dot_dimension_numbers<[1], [0], [0], [1], [0, 0, 1, 1], [], []>} : vector<16x32xf32>, vector<32x32xf32>, vector<16x32xf32> -> vector<16x32xf32>
    %c0_29 = arith.constant 0 : index
    %c0_30 = arith.constant 0 : index
    %c0_31 = arith.constant 0 : index
    %93 = vector.load %arg8[%c0_29, %c0_30, %c0_31] : memref<2x1x32xf32, #tpu.memory_space<vmem>>, vector<1x1x32xf32>
    %94 = vector.shape_cast %93 : vector<1x1x32xf32> to vector<1x32xf32>
    %95 = vector.broadcast %94 : vector<1x32xf32> to vector<16x32xf32>
    %96 = arith.addf %92, %95 : vector<16x32xf32>
    %97 = arith.addf %96, %24 : vector<16x32xf32>
    %c0_32 = arith.constant 0 : index
    %c0_33 = arith.constant 0 : index
    %c0_34 = arith.constant 0 : index
    %98 = vector.load %arg9[%c0_32, %c0_33, %c0_34] : memref<2x1x32xf32, #tpu.memory_space<vmem>>, vector<1x1x32xf32>
    %99 = vector.shape_cast %98 : vector<1x1x32xf32> to vector<1x32xf32>
    %c0_35 = arith.constant 0 : index
    %c0_36 = arith.constant 0 : index
    %c0_37 = arith.constant 0 : index
    %100 = vector.load %arg10[%c0_35, %c0_36, %c0_37] : memref<2x1x32xf32, #tpu.memory_space<vmem>>, vector<1x1x32xf32>
    %101 = vector.shape_cast %100 : vector<1x1x32xf32> to vector<1x32xf32>
    %cst_38 = arith.constant dense<0.000000e+00> : vector<16xf32>
    %102 = vector.multi_reduction <add>, %97, %cst_38 [1] : vector<16x32xf32> to vector<16xf32>
    %103 = vector.shape_cast %102 : vector<16xf32> to vector<16x1xf32>
    %cst_39 = arith.constant 3.200000e+01 : f32
    %104 = vector.broadcast %cst_39 : f32 to vector<16x1xf32>
    %105 = arith.divf %103, %104 : vector<16x1xf32>
    %106 = vector.broadcast %105 : vector<16x1xf32> to vector<16x32xf32>
    %107 = arith.subf %97, %106 : vector<16x32xf32>
    %108 = arith.mulf %107, %107 : vector<16x32xf32>
    %cst_40 = arith.constant dense<0.000000e+00> : vector<16xf32>
    %109 = vector.multi_reduction <add>, %108, %cst_40 [1] : vector<16x32xf32> to vector<16xf32>
    %110 = vector.shape_cast %109 : vector<16xf32> to vector<16x1xf32>
    %cst_41 = arith.constant 3.200000e+01 : f32
    %111 = vector.broadcast %cst_41 : f32 to vector<16x1xf32>
    %112 = arith.divf %110, %111 : vector<16x1xf32>
    %113 = vector.broadcast %105 : vector<16x1xf32> to vector<16x32xf32>
    %114 = arith.subf %97, %113 : vector<16x32xf32>
    %cst_42 = arith.constant 9.99999996E-13 : f32
    %115 = vector.broadcast %cst_42 : f32 to vector<16x1xf32>
    %116 = arith.addf %112, %115 : vector<16x1xf32>
    %117 = math.rsqrt %116 : vector<16x1xf32>
    %118 = vector.broadcast %117 : vector<16x1xf32> to vector<16x32xf32>
    %119 = arith.mulf %114, %118 : vector<16x32xf32>
    %120 = vector.broadcast %99 : vector<1x32xf32> to vector<16x32xf32>
    %121 = arith.mulf %119, %120 : vector<16x32xf32>
    %122 = vector.broadcast %101 : vector<1x32xf32> to vector<16x32xf32>
    %123 = arith.addf %121, %122 : vector<16x32xf32>
    %c0_43 = arith.constant 0 : index
    %c0_44 = arith.constant 0 : index
    %c0_45 = arith.constant 0 : index
    %124 = vector.load %arg11[%c0_43, %c0_44, %c0_45] : memref<2x32x64xf32, #tpu.memory_space<vmem>>, vector<1x32x64xf32>
    %125 = vector.shape_cast %124 : vector<1x32x64xf32> to vector<32x64xf32>
    %cst_46 = arith.constant dense<0.000000e+00> : vector<16x64xf32>
    %126 = tpu.matmul %123, %125, %cst_46 {dimension_numbers = #tpu.dot_dimension_numbers<[1], [0], [0], [1], [0, 0, 1, 1], [], []>} : vector<16x32xf32>, vector<32x64xf32>, vector<16x64xf32> -> vector<16x64xf32>
    %c0_47 = arith.constant 0 : index
    %c0_48 = arith.constant 0 : index
    %c0_49 = arith.constant 0 : index
    %127 = vector.load %arg12[%c0_47, %c0_48, %c0_49] : memref<2x1x64xf32, #tpu.memory_space<vmem>>, vector<1x1x64xf32>
    %128 = vector.shape_cast %127 : vector<1x1x64xf32> to vector<1x64xf32>
    %129 = vector.broadcast %128 : vector<1x64xf32> to vector<16x64xf32>
    %130 = arith.addf %126, %129 : vector<16x64xf32>
    %cst_50 = arith.constant 5.000000e-01 : f32
    %131 = vector.broadcast %cst_50 : f32 to vector<16x64xf32>
    %132 = arith.mulf %131, %130 : vector<16x64xf32>
    %133 = arith.mulf %130, %130 : vector<16x64xf32>
    %134 = arith.mulf %133, %130 : vector<16x64xf32>
    %cst_51 = arith.constant 4.471500e-02 : f32
    %135 = vector.broadcast %cst_51 : f32 to vector<16x64xf32>
    %136 = arith.mulf %135, %134 : vector<16x64xf32>
    %137 = arith.addf %130, %136 : vector<16x64xf32>
    %cst_52 = arith.constant 0.797884583 : f32
    %138 = vector.broadcast %cst_52 : f32 to vector<16x64xf32>
    %139 = arith.mulf %138, %137 : vector<16x64xf32>
    %140 = math.tanh %139 : vector<16x64xf32>
    %cst_53 = arith.constant 1.000000e+00 : f32
    %141 = vector.broadcast %cst_53 : f32 to vector<16x64xf32>
    %142 = arith.addf %141, %140 : vector<16x64xf32>
    %143 = arith.mulf %132, %142 : vector<16x64xf32>
    %c0_54 = arith.constant 0 : index
    %c0_55 = arith.constant 0 : index
    %c0_56 = arith.constant 0 : index
    %144 = vector.load %arg13[%c0_54, %c0_55, %c0_56] : memref<2x64x32xf32, #tpu.memory_space<vmem>>, vector<1x64x32xf32>
    %145 = vector.shape_cast %144 : vector<1x64x32xf32> to vector<64x32xf32>
    %cst_57 = arith.constant dense<0.000000e+00> : vector<16x32xf32>
    %146 = tpu.matmul %143, %145, %cst_57 {dimension_numbers = #tpu.dot_dimension_numbers<[1], [0], [0], [1], [0, 0, 1, 1], [], []>} : vector<16x64xf32>, vector<64x32xf32>, vector<16x32xf32> -> vector<16x32xf32>
    %c0_58 = arith.constant 0 : index
    %c0_59 = arith.constant 0 : index
    %c0_60 = arith.constant 0 : index
    %147 = vector.load %arg14[%c0_58, %c0_59, %c0_60] : memref<2x1x32xf32, #tpu.memory_space<vmem>>, vector<1x1x32xf32>
    %148 = vector.shape_cast %147 : vector<1x1x32xf32> to vector<1x32xf32>
    %149 = vector.broadcast %148 : vector<1x32xf32> to vector<16x32xf32>
    %150 = arith.addf %146, %149 : vector<16x32xf32>
    %151 = arith.addf %150, %123 : vector<16x32xf32>
    %c0_61 = arith.constant 0 : index
    %c0_62 = arith.constant 0 : index
    %c0_63 = arith.constant 0 : index
    %152 = vector.load %arg15[%c0_61, %c0_62, %c0_63] : memref<2x1x32xf32, #tpu.memory_space<vmem>>, vector<1x1x32xf32>
    %153 = vector.shape_cast %152 : vector<1x1x32xf32> to vector<1x32xf32>
    %c0_64 = arith.constant 0 : index
    %c0_65 = arith.constant 0 : index
    %c0_66 = arith.constant 0 : index
    %154 = vector.load %arg16[%c0_64, %c0_65, %c0_66] : memref<2x1x32xf32, #tpu.memory_space<vmem>>, vector<1x1x32xf32>
    %155 = vector.shape_cast %154 : vector<1x1x32xf32> to vector<1x32xf32>
    %cst_67 = arith.constant dense<0.000000e+00> : vector<16xf32>
    %156 = vector.multi_reduction <add>, %151, %cst_67 [1] : vector<16x32xf32> to vector<16xf32>
    %157 = vector.shape_cast %156 : vector<16xf32> to vector<16x1xf32>
    %cst_68 = arith.constant 3.200000e+01 : f32
    %158 = vector.broadcast %cst_68 : f32 to vector<16x1xf32>
    %159 = arith.divf %157, %158 : vector<16x1xf32>
    %160 = vector.broadcast %159 : vector<16x1xf32> to vector<16x32xf32>
    %161 = arith.subf %151, %160 : vector<16x32xf32>
    %162 = arith.mulf %161, %161 : vector<16x32xf32>
    %cst_69 = arith.constant dense<0.000000e+00> : vector<16xf32>
    %163 = vector.multi_reduction <add>, %162, %cst_69 [1] : vector<16x32xf32> to vector<16xf32>
    %164 = vector.shape_cast %163 : vector<16xf32> to vector<16x1xf32>
    %cst_70 = arith.constant 3.200000e+01 : f32
    %165 = vector.broadcast %cst_70 : f32 to vector<16x1xf32>
    %166 = arith.divf %164, %165 : vector<16x1xf32>
    %167 = vector.broadcast %159 : vector<16x1xf32> to vector<16x32xf32>
    %168 = arith.subf %151, %167 : vector<16x32xf32>
    %cst_71 = arith.constant 9.99999996E-13 : f32
    %169 = vector.broadcast %cst_71 : f32 to vector<16x1xf32>
    %170 = arith.addf %166, %169 : vector<16x1xf32>
    %171 = math.rsqrt %170 : vector<16x1xf32>
    %172 = vector.broadcast %171 : vector<16x1xf32> to vector<16x32xf32>
    %173 = arith.mulf %168, %172 : vector<16x32xf32>
    %174 = vector.broadcast %153 : vector<1x32xf32> to vector<16x32xf32>
    %175 = arith.mulf %173, %174 : vector<16x32xf32>
    %176 = vector.broadcast %155 : vector<1x32xf32> to vector<16x32xf32>
    %177 = arith.addf %175, %176 : vector<16x32xf32>
    %c1 = arith.constant 1 : index
    %c0_72 = arith.constant 0 : index
    %c0_73 = arith.constant 0 : index
    %178 = vector.load %arg5[%c1, %c0_72, %c0_73] : memref<2x32x96xf32, #tpu.memory_space<vmem>>, vector<1x32x96xf32>
    %179 = vector.shape_cast %178 : vector<1x32x96xf32> to vector<32x96xf32>
    %cst_74 = arith.constant dense<0.000000e+00> : vector<16x96xf32>
    %180 = tpu.matmul %177, %179, %cst_74 {dimension_numbers = #tpu.dot_dimension_numbers<[1], [0], [0], [1], [0, 0, 1, 1], [], []>} : vector<16x32xf32>, vector<32x96xf32>, vector<16x96xf32> -> vector<16x96xf32>
    %c1_75 = arith.constant 1 : index
    %c0_76 = arith.constant 0 : index
    %c0_77 = arith.constant 0 : index
    %181 = vector.load %arg6[%c1_75, %c0_76, %c0_77] : memref<2x1x96xf32, #tpu.memory_space<vmem>>, vector<1x1x96xf32>
    %182 = vector.shape_cast %181 : vector<1x1x96xf32> to vector<1x96xf32>
    %183 = vector.broadcast %182 : vector<1x96xf32> to vector<16x96xf32>
    %184 = arith.addf %180, %183 : vector<16x96xf32>
    %185 = vector.extract_strided_slice %184 {offsets = [0, 0], sizes = [16, 8], strides = [1, 1]} : vector<16x96xf32> to vector<16x8xf32>
    %186 = vector.shape_cast %185 : vector<16x8xf32> to vector<2x8x8xf32>
    %187 = vector.extract_strided_slice %184 {offsets = [0, 8], sizes = [16, 8], strides = [1, 1]} : vector<16x96xf32> to vector<16x8xf32>
    %188 = vector.shape_cast %187 : vector<16x8xf32> to vector<2x8x8xf32>
    %189 = vector.extract_strided_slice %184 {offsets = [0, 16], sizes = [16, 8], strides = [1, 1]} : vector<16x96xf32> to vector<16x8xf32>
    %190 = vector.shape_cast %189 : vector<16x8xf32> to vector<2x8x8xf32>
    %191 = vector.extract_strided_slice %184 {offsets = [0, 24], sizes = [16, 8], strides = [1, 1]} : vector<16x96xf32> to vector<16x8xf32>
    %192 = vector.shape_cast %191 : vector<16x8xf32> to vector<2x8x8xf32>
    %193 = tpu.concatenate %186, %188, %190, %192 in 0 : vector<2x8x8xf32>, vector<2x8x8xf32>, vector<2x8x8xf32>, vector<2x8x8xf32> -> vector<8x8x8xf32>
    %194 = vector.extract_strided_slice %184 {offsets = [0, 32], sizes = [16, 8], strides = [1, 1]} : vector<16x96xf32> to vector<16x8xf32>
    %195 = vector.shape_cast %194 : vector<16x8xf32> to vector<2x8x8xf32>
    %196 = vector.extract_strided_slice %184 {offsets = [0, 40], sizes = [16, 8], strides = [1, 1]} : vector<16x96xf32> to vector<16x8xf32>
    %197 = vector.shape_cast %196 : vector<16x8xf32> to vector<2x8x8xf32>
    %198 = vector.extract_strided_slice %184 {offsets = [0, 48], sizes = [16, 8], strides = [1, 1]} : vector<16x96xf32> to vector<16x8xf32>
    %199 = vector.shape_cast %198 : vector<16x8xf32> to vector<2x8x8xf32>
    %200 = vector.extract_strided_slice %184 {offsets = [0, 56], sizes = [16, 8], strides = [1, 1]} : vector<16x96xf32> to vector<16x8xf32>
    %201 = vector.shape_cast %200 : vector<16x8xf32> to vector<2x8x8xf32>
    %202 = tpu.concatenate %195, %197, %199, %201 in 0 : vector<2x8x8xf32>, vector<2x8x8xf32>, vector<2x8x8xf32>, vector<2x8x8xf32> -> vector<8x8x8xf32>
    %203 = vector.extract_strided_slice %184 {offsets = [0, 64], sizes = [16, 8], strides = [1, 1]} : vector<16x96xf32> to vector<16x8xf32>
    %204 = vector.shape_cast %203 : vector<16x8xf32> to vector<2x8x8xf32>
    %205 = vector.extract_strided_slice %184 {offsets = [0, 72], sizes = [16, 8], strides = [1, 1]} : vector<16x96xf32> to vector<16x8xf32>
    %206 = vector.shape_cast %205 : vector<16x8xf32> to vector<2x8x8xf32>
    %207 = vector.extract_strided_slice %184 {offsets = [0, 80], sizes = [16, 8], strides = [1, 1]} : vector<16x96xf32> to vector<16x8xf32>
    %208 = vector.shape_cast %207 : vector<16x8xf32> to vector<2x8x8xf32>
    %209 = vector.extract_strided_slice %184 {offsets = [0, 88], sizes = [16, 8], strides = [1, 1]} : vector<16x96xf32> to vector<16x8xf32>
    %210 = vector.shape_cast %209 : vector<16x8xf32> to vector<2x8x8xf32>
    %211 = tpu.concatenate %204, %206, %208, %210 in 0 : vector<2x8x8xf32>, vector<2x8x8xf32>, vector<2x8x8xf32>, vector<2x8x8xf32> -> vector<8x8x8xf32>
    "tpu.trace_start"() <{level = 10 : i32, message = "bqd,bkd->bqk"}> : () -> ()
    %cst_78 = arith.constant dense<0.000000e+00> : vector<8x8x8xf32>
    %212 = tpu.matmul %193, %202, %cst_78 {dimension_numbers = #tpu.dot_dimension_numbers<[2], [2], [1], [1], [0, 0, 0, 1, 1, 1], [0], [0]>} : vector<8x8x8xf32>, vector<8x8x8xf32>, vector<8x8x8xf32> -> vector<8x8x8xf32>
    "tpu.trace_stop"() : () -> ()
    %cst_79 = arith.constant 0.353553385 : f32
    %213 = vector.broadcast %cst_79 : f32 to vector<8x8x8xf32>
    %214 = arith.mulf %212, %213 : vector<8x8x8xf32>
    %215 = vector.broadcast %31 : vector<8x1x8xf32> to vector<8x8x8xf32>
    %216 = arith.addf %214, %215 : vector<8x8x8xf32>
    %cst_80 = arith.constant dense<0xFF800000> : vector<8x8xf32>
    %217 = vector.multi_reduction <maximumf>, %216, %cst_80 [2] : vector<8x8x8xf32> to vector<8x8xf32>
    %218 = vector.shape_cast %217 : vector<8x8xf32> to vector<8x8x1xf32>
    %219 = vector.broadcast %218 : vector<8x8x1xf32> to vector<8x8x8xf32>
    %220 = arith.subf %216, %219 : vector<8x8x8xf32>
    %221 = math.exp %220 : vector<8x8x8xf32>
    %cst_81 = arith.constant dense<0.000000e+00> : vector<8x8xf32>
    %222 = vector.multi_reduction <add>, %221, %cst_81 [2] : vector<8x8x8xf32> to vector<8x8xf32>
    %223 = vector.shape_cast %222 : vector<8x8xf32> to vector<8x8x1xf32>
    %224 = vector.broadcast %223 : vector<8x8x1xf32> to vector<8x8x8xf32>
    %225 = arith.divf %221, %224 : vector<8x8x8xf32>
    "tpu.trace_start"() <{level = 10 : i32, message = "bqk,bkd->bqd"}> : () -> ()
    %cst_82 = arith.constant dense<0.000000e+00> : vector<8x8x8xf32>
    %226 = tpu.matmul %225, %211, %cst_82 {dimension_numbers = #tpu.dot_dimension_numbers<[2], [1], [1], [2], [0, 0, 0, 1, 1, 2], [0], [0]>} : vector<8x8x8xf32>, vector<8x8x8xf32>, vector<8x8x8xf32> -> vector<8x8x8xf32>
    "tpu.trace_stop"() : () -> ()
    %227 = vector.extract_strided_slice %226 {offsets = [0, 0, 0], sizes = [2, 8, 8], strides = [1, 1, 1]} : vector<8x8x8xf32> to vector<2x8x8xf32>
    %228 = vector.shape_cast %227 : vector<2x8x8xf32> to vector<16x8xf32>
    %229 = vector.extract_strided_slice %226 {offsets = [2, 0, 0], sizes = [2, 8, 8], strides = [1, 1, 1]} : vector<8x8x8xf32> to vector<2x8x8xf32>
    %230 = vector.shape_cast %229 : vector<2x8x8xf32> to vector<16x8xf32>
    %231 = vector.extract_strided_slice %226 {offsets = [4, 0, 0], sizes = [2, 8, 8], strides = [1, 1, 1]} : vector<8x8x8xf32> to vector<2x8x8xf32>
    %232 = vector.shape_cast %231 : vector<2x8x8xf32> to vector<16x8xf32>
    %233 = vector.extract_strided_slice %226 {offsets = [6, 0, 0], sizes = [2, 8, 8], strides = [1, 1, 1]} : vector<8x8x8xf32> to vector<2x8x8xf32>
    %234 = vector.shape_cast %233 : vector<2x8x8xf32> to vector<16x8xf32>
    %235 = tpu.concatenate %228, %230, %232, %234 in 1 : vector<16x8xf32>, vector<16x8xf32>, vector<16x8xf32>, vector<16x8xf32> -> vector<16x32xf32>
    %c1_83 = arith.constant 1 : index
    %c0_84 = arith.constant 0 : index
    %c0_85 = arith.constant 0 : index
    %236 = vector.load %arg7[%c1_83, %c0_84, %c0_85] : memref<2x32x32xf32, #tpu.memory_space<vmem>>, vector<1x32x32xf32>
    %237 = vector.shape_cast %236 : vector<1x32x32xf32> to vector<32x32xf32>
    %cst_86 = arith.constant dense<0.000000e+00> : vector<16x32xf32>
    %238 = tpu.matmul %235, %237, %cst_86 {dimension_numbers = #tpu.dot_dimension_numbers<[1], [0], [0], [1], [0, 0, 1, 1], [], []>} : vector<16x32xf32>, vector<32x32xf32>, vector<16x32xf32> -> vector<16x32xf32>
    %c1_87 = arith.constant 1 : index
    %c0_88 = arith.constant 0 : index
    %c0_89 = arith.constant 0 : index
    %239 = vector.load %arg8[%c1_87, %c0_88, %c0_89] : memref<2x1x32xf32, #tpu.memory_space<vmem>>, vector<1x1x32xf32>
    %240 = vector.shape_cast %239 : vector<1x1x32xf32> to vector<1x32xf32>
    %241 = vector.broadcast %240 : vector<1x32xf32> to vector<16x32xf32>
    %242 = arith.addf %238, %241 : vector<16x32xf32>
    %243 = arith.addf %242, %177 : vector<16x32xf32>
    %c1_90 = arith.constant 1 : index
    %c0_91 = arith.constant 0 : index
    %c0_92 = arith.constant 0 : index
    %244 = vector.load %arg9[%c1_90, %c0_91, %c0_92] : memref<2x1x32xf32, #tpu.memory_space<vmem>>, vector<1x1x32xf32>
    %245 = vector.shape_cast %244 : vector<1x1x32xf32> to vector<1x32xf32>
    %c1_93 = arith.constant 1 : index
    %c0_94 = arith.constant 0 : index
    %c0_95 = arith.constant 0 : index
    %246 = vector.load %arg10[%c1_93, %c0_94, %c0_95] : memref<2x1x32xf32, #tpu.memory_space<vmem>>, vector<1x1x32xf32>
    %247 = vector.shape_cast %246 : vector<1x1x32xf32> to vector<1x32xf32>
    %cst_96 = arith.constant dense<0.000000e+00> : vector<16xf32>
    %248 = vector.multi_reduction <add>, %243, %cst_96 [1] : vector<16x32xf32> to vector<16xf32>
    %249 = vector.shape_cast %248 : vector<16xf32> to vector<16x1xf32>
    %cst_97 = arith.constant 3.200000e+01 : f32
    %250 = vector.broadcast %cst_97 : f32 to vector<16x1xf32>
    %251 = arith.divf %249, %250 : vector<16x1xf32>
    %252 = vector.broadcast %251 : vector<16x1xf32> to vector<16x32xf32>
    %253 = arith.subf %243, %252 : vector<16x32xf32>
    %254 = arith.mulf %253, %253 : vector<16x32xf32>
    %cst_98 = arith.constant dense<0.000000e+00> : vector<16xf32>
    %255 = vector.multi_reduction <add>, %254, %cst_98 [1] : vector<16x32xf32> to vector<16xf32>
    %256 = vector.shape_cast %255 : vector<16xf32> to vector<16x1xf32>
    %cst_99 = arith.constant 3.200000e+01 : f32
    %257 = vector.broadcast %cst_99 : f32 to vector<16x1xf32>
    %258 = arith.divf %256, %257 : vector<16x1xf32>
    %259 = vector.broadcast %251 : vector<16x1xf32> to vector<16x32xf32>
    %260 = arith.subf %243, %259 : vector<16x32xf32>
    %cst_100 = arith.constant 9.99999996E-13 : f32
    %261 = vector.broadcast %cst_100 : f32 to vector<16x1xf32>
    %262 = arith.addf %258, %261 : vector<16x1xf32>
    %263 = math.rsqrt %262 : vector<16x1xf32>
    %264 = vector.broadcast %263 : vector<16x1xf32> to vector<16x32xf32>
    %265 = arith.mulf %260, %264 : vector<16x32xf32>
    %266 = vector.broadcast %245 : vector<1x32xf32> to vector<16x32xf32>
    %267 = arith.mulf %265, %266 : vector<16x32xf32>
    %268 = vector.broadcast %247 : vector<1x32xf32> to vector<16x32xf32>
    %269 = arith.addf %267, %268 : vector<16x32xf32>
    %c1_101 = arith.constant 1 : index
    %c0_102 = arith.constant 0 : index
    %c0_103 = arith.constant 0 : index
    %270 = vector.load %arg11[%c1_101, %c0_102, %c0_103] : memref<2x32x64xf32, #tpu.memory_space<vmem>>, vector<1x32x64xf32>
    %271 = vector.shape_cast %270 : vector<1x32x64xf32> to vector<32x64xf32>
    %cst_104 = arith.constant dense<0.000000e+00> : vector<16x64xf32>
    %272 = tpu.matmul %269, %271, %cst_104 {dimension_numbers = #tpu.dot_dimension_numbers<[1], [0], [0], [1], [0, 0, 1, 1], [], []>} : vector<16x32xf32>, vector<32x64xf32>, vector<16x64xf32> -> vector<16x64xf32>
    %c1_105 = arith.constant 1 : index
    %c0_106 = arith.constant 0 : index
    %c0_107 = arith.constant 0 : index
    %273 = vector.load %arg12[%c1_105, %c0_106, %c0_107] : memref<2x1x64xf32, #tpu.memory_space<vmem>>, vector<1x1x64xf32>
    %274 = vector.shape_cast %273 : vector<1x1x64xf32> to vector<1x64xf32>
    %275 = vector.broadcast %274 : vector<1x64xf32> to vector<16x64xf32>
    %276 = arith.addf %272, %275 : vector<16x64xf32>
    %cst_108 = arith.constant 5.000000e-01 : f32
    %277 = vector.broadcast %cst_108 : f32 to vector<16x64xf32>
    %278 = arith.mulf %277, %276 : vector<16x64xf32>
    %279 = arith.mulf %276, %276 : vector<16x64xf32>
    %280 = arith.mulf %279, %276 : vector<16x64xf32>
    %cst_109 = arith.constant 4.471500e-02 : f32
    %281 = vector.broadcast %cst_109 : f32 to vector<16x64xf32>
    %282 = arith.mulf %281, %280 : vector<16x64xf32>
    %283 = arith.addf %276, %282 : vector<16x64xf32>
    %cst_110 = arith.constant 0.797884583 : f32
    %284 = vector.broadcast %cst_110 : f32 to vector<16x64xf32>
    %285 = arith.mulf %284, %283 : vector<16x64xf32>
    %286 = math.tanh %285 : vector<16x64xf32>
    %cst_111 = arith.constant 1.000000e+00 : f32
    %287 = vector.broadcast %cst_111 : f32 to vector<16x64xf32>
    %288 = arith.addf %287, %286 : vector<16x64xf32>
    %289 = arith.mulf %278, %288 : vector<16x64xf32>
    %c1_112 = arith.constant 1 : index
    %c0_113 = arith.constant 0 : index
    %c0_114 = arith.constant 0 : index
    %290 = vector.load %arg13[%c1_112, %c0_113, %c0_114] : memref<2x64x32xf32, #tpu.memory_space<vmem>>, vector<1x64x32xf32>
    %291 = vector.shape_cast %290 : vector<1x64x32xf32> to vector<64x32xf32>
    %cst_115 = arith.constant dense<0.000000e+00> : vector<16x32xf32>
    %292 = tpu.matmul %289, %291, %cst_115 {dimension_numbers = #tpu.dot_dimension_numbers<[1], [0], [0], [1], [0, 0, 1, 1], [], []>} : vector<16x64xf32>, vector<64x32xf32>, vector<16x32xf32> -> vector<16x32xf32>
    %c1_116 = arith.constant 1 : index
    %c0_117 = arith.constant 0 : index
    %c0_118 = arith.constant 0 : index
    %293 = vector.load %arg14[%c1_116, %c0_117, %c0_118] : memref<2x1x32xf32, #tpu.memory_space<vmem>>, vector<1x1x32xf32>
    %294 = vector.shape_cast %293 : vector<1x1x32xf32> to vector<1x32xf32>
    %295 = vector.broadcast %294 : vector<1x32xf32> to vector<16x32xf32>
    %296 = arith.addf %292, %295 : vector<16x32xf32>
    %297 = arith.addf %296, %269 : vector<16x32xf32>
    %c1_119 = arith.constant 1 : index
    %c0_120 = arith.constant 0 : index
    %c0_121 = arith.constant 0 : index
    %298 = vector.load %arg15[%c1_119, %c0_120, %c0_121] : memref<2x1x32xf32, #tpu.memory_space<vmem>>, vector<1x1x32xf32>
    %299 = vector.shape_cast %298 : vector<1x1x32xf32> to vector<1x32xf32>
    %c1_122 = arith.constant 1 : index
    %c0_123 = arith.constant 0 : index
    %c0_124 = arith.constant 0 : index
    %300 = vector.load %arg16[%c1_122, %c0_123, %c0_124] : memref<2x1x32xf32, #tpu.memory_space<vmem>>, vector<1x1x32xf32>
    %301 = vector.shape_cast %300 : vector<1x1x32xf32> to vector<1x32xf32>
    %cst_125 = arith.constant dense<0.000000e+00> : vector<16xf32>
    %302 = vector.multi_reduction <add>, %297, %cst_125 [1] : vector<16x32xf32> to vector<16xf32>
    %303 = vector.shape_cast %302 : vector<16xf32> to vector<16x1xf32>
    %cst_126 = arith.constant 3.200000e+01 : f32
    %304 = vector.broadcast %cst_126 : f32 to vector<16x1xf32>
    %305 = arith.divf %303, %304 : vector<16x1xf32>
    %306 = vector.broadcast %305 : vector<16x1xf32> to vector<16x32xf32>
    %307 = arith.subf %297, %306 : vector<16x32xf32>
    %308 = arith.mulf %307, %307 : vector<16x32xf32>
    %cst_127 = arith.constant dense<0.000000e+00> : vector<16xf32>
    %309 = vector.multi_reduction <add>, %308, %cst_127 [1] : vector<16x32xf32> to vector<16xf32>
    %310 = vector.shape_cast %309 : vector<16xf32> to vector<16x1xf32>
    %cst_128 = arith.constant 3.200000e+01 : f32
    %311 = vector.broadcast %cst_128 : f32 to vector<16x1xf32>
    %312 = arith.divf %310, %311 : vector<16x1xf32>
    %313 = vector.broadcast %305 : vector<16x1xf32> to vector<16x32xf32>
    %314 = arith.subf %297, %313 : vector<16x32xf32>
    %cst_129 = arith.constant 9.99999996E-13 : f32
    %315 = vector.broadcast %cst_129 : f32 to vector<16x1xf32>
    %316 = arith.addf %312, %315 : vector<16x1xf32>
    %317 = math.rsqrt %316 : vector<16x1xf32>
    %318 = vector.broadcast %317 : vector<16x1xf32> to vector<16x32xf32>
    %319 = arith.mulf %314, %318 : vector<16x32xf32>
    %320 = vector.broadcast %299 : vector<1x32xf32> to vector<16x32xf32>
    %321 = arith.mulf %319, %320 : vector<16x32xf32>
    %322 = vector.broadcast %301 : vector<1x32xf32> to vector<16x32xf32>
    %323 = arith.addf %321, %322 : vector<16x32xf32>
    %324 = vector.shape_cast %323 : vector<16x32xf32> to vector<2x8x32xf32>
    %325 = vector.extract_strided_slice %324 {offsets = [0, 0, 0], sizes = [2, 1, 32], strides = [1, 1, 1]} : vector<2x8x32xf32> to vector<2x1x32xf32>
    %326 = vector.shape_cast %325 : vector<2x1x32xf32> to vector<2x32xf32>
    %c0_130 = arith.constant 0 : index
    %c0_131 = arith.constant 0 : index
    %327 = vector.load %arg17[%c0_130, %c0_131] : memref<32x32xf32, #tpu.memory_space<vmem>>, vector<32x32xf32>
    %cst_132 = arith.constant dense<0.000000e+00> : vector<2x32xf32>
    %328 = tpu.matmul %326, %327, %cst_132 {dimension_numbers = #tpu.dot_dimension_numbers<[1], [0], [0], [1], [0, 0, 1, 1], [], []>} : vector<2x32xf32>, vector<32x32xf32>, vector<2x32xf32> -> vector<2x32xf32>
    %c0_133 = arith.constant 0 : index
    %c0_134 = arith.constant 0 : index
    %329 = vector.load %arg18[%c0_133, %c0_134] : memref<1x32xf32, #tpu.memory_space<vmem>>, vector<1x32xf32>
    %330 = vector.broadcast %329 : vector<1x32xf32> to vector<2x32xf32>
    %331 = arith.addf %328, %330 : vector<2x32xf32>
    %332 = math.tanh %331 : vector<2x32xf32>
    %c0_135 = arith.constant 0 : index
    %c0_136 = arith.constant 0 : index
    %333 = vector.load %arg2[%c0_135, %c0_136] : memref<2x32xf32, #tpu.memory_space<vmem>>, vector<2x32xf32>
    %334 = arith.mulf %332, %333 : vector<2x32xf32>
    %c0_137 = arith.constant 0 : index
    %c0_138 = arith.constant 0 : index
    %335 = vector.load %arg19[%c0_137, %c0_138] : memref<2x32xf32, #tpu.memory_space<vmem>>, vector<2x32xf32>
    tpu.vector_store %arg19[%c0_137, %c0_138], %334 {strides = array<i32>} : memref<2x32xf32, #tpu.memory_space<vmem>>, vector<2x32xf32>,
    return
  }
}

</mosaic_0001>

<bundles_post_ra>
// kernel: tpu_custom_call.1
= control target key start
LH: loop header
LB: loop body
LE: loop exit
PB: predicated region body
PF: predicated region fallthrough
CT: control target
= control target key end

     0   :  { %s5899_s0 = inlined_call_operand.hbm [shape: f32[16,32], index: 0, kind: input, shape index: {}]   ;;  %s5900_s1 = inlined_call_operand.vmem [shape: f32[2,8], index: 1, kind: input, shape index: {}]   ;;  %s5901_s2 = inlined_call_operand.hbm [shape: f32[2,32], index: 2, kind: input, shape index: {}]   ;;  %s5902_s3 = inlined_call_operand.hbm [shape: f32[1,32], index: 3, kind: input, shape index: {}]   ;;  %s5903_s4 = inlined_call_operand.hbm [shape: f32[1,32], index: 4, kind: input, shape index: {}]   ;;  %s5904_s5 = inlined_call_operand.vmem [shape: f32[2,32,96], index: 5, kind: input, shape index: {}]   ;;  %s5905_s6 = inlined_call_operand.hbm [shape: f32[2,1,96], index: 6, kind: input, shape index: {}]   ;;  %s5906_s7 = inlined_call_operand.vmem [shape: f32[2,32,32], index: 7, kind: input, shape index: {}]   ;;  %s5907_s8 = inlined_call_operand.hbm [shape: f32[2,1,32], index: 8, kind: input, shape index: {}]   ;;  %s5908_s9 = inlined_call_operand.hbm [shape: f32[2,1,32], index: 9, kind: input, shape index: {}]   ;;  %s5909_s10 = inlined_call_operand.vmem [shape: f32[2,1,32], index: 10, kind: input, shape index: {}]   ;;  %s5910_s11 = inlined_call_operand.vmem [shape: f32[2,32,64], index: 11, kind: input, shape index: {}]   ;;  %s5911_s12 = inlined_call_operand.vmem [shape: f32[2,1,64], index: 12, kind: input, shape index: {}]   ;;  %s5912_s13 = inlined_call_operand.vmem [shape: f32[2,64,32], index: 13, kind: input, shape index: {}]   ;;  %s5913_s14 = inlined_call_operand.vmem [shape: f32[2,1,32], index: 14, kind: input, shape index: {}]   ;;  %s5914_s15 = inlined_call_operand.vmem [shape: f32[2,1,32], index: 15, kind: input, shape index: {}]   ;;  %s5915_s16 = inlined_call_operand.vmem [shape: f32[2,1,32], index: 16, kind: input, shape index: {}]   ;;  %s5916_s17 = inlined_call_operand.vmem [shape: f32[32,32], index: 17, kind: input, shape index: {}]   ;;  %s5917_s18 = inlined_call_operand.vmem [shape: f32[1,32], index: 18, kind: input, shape index: {}]   ;;  %s5918_s19 = inlined_call_operand.hbm [shape: f32[2,32], index: 19, kind: output, shape index: {}]  }
   0x1   :  { %5927 = sst [smem:[#allocation20_spill]] %s5899_s0 }
   0x2   :  { %5928 = sst [smem:[#allocation21_spill]] %s5900_s1 }
   0x3   :  { %5929 = sst [smem:[#allocation22_spill]] %s5901_s2 }
   0x4   :  { %5930 = sst [smem:[#allocation23_spill]] %s5902_s3 }
   0x5   :  { %5931 = sst [smem:[#allocation24_spill]] %s5918_s19 }
   0x6   :  { %24 = vsyncpa [#allocation3], 0 }
   0x7   :  { %25 = vsyncpa [#allocation6], 0 }
   0x8   :  { %26 = vsyncpa [#allocation9], 0 }
   0x9   :  { %27 = vsyncpa [#allocation12], 0 }
   0xa   :  { %28 = vsyncpa [#allocation4], 0  ;;  %s5022_s0 = smov [#allocation5]   ;;  %s5023_s20 = smov [#allocation8]  }
   0xb   :  { %s49_s30 = sshll.u32 %s5022_s0, 4  ;;  %s69_s21 = sshll.u32 %s5023_s20, 4  ;;  %s50_s30 = int_to_ptr.vmem [resolvable:$true] %s49_s30  ;;  %s70_s21 = int_to_ptr.vmem [resolvable:$true] %s69_s21 }
   0xc   :  { %s5932_s2 = sld [smem:[#allocation22_spill]] }
  0x12   :  { %s4836_s23 = scalar_lea.hbm %s5932_s2, 32 }
  0x13   :  { %p4837_p0 = scmp.ne.s32.totalorder %s5932_s2, %s4836_s23  ;;  %p4840_p1 = scmp.lt.u32.totalorder %s4836_s23, %s5932_s2 }
  0x15   :  { %p4842_p2 = pnand %p4840_p1, %p4837_p0 }
  0x17   :  { %4845 = shalt.err (!%p4842_p2)
}
  0x18   :  { %s4846_s27 = scalar_lea.vmem %s50_s30, 32  ;;  %p4851_p4 = scmp.lt.s32.totalorder %s50_s30, %s50_s30 }
  0x19   :  { %p4847_p3 = scmp.ne.s32.totalorder %s50_s30, %s4846_s27  ;;  %p4852_p5 = scmp.lt.s32.totalorder %s4846_s27, %s4846_s27 }
  0x1b   :  { %p4853_p6 = por %p4852_p5, %p4851_p4 }
  0x1d   :  { %p4854_p7 = pnand %p4853_p6, %p4847_p3 }
  0x1f   :  { %4857 = shalt.err (!%p4854_p7)
}
  0x20   :  { %52 = dma.hbm_to_vmem [thread:$0]  %s5932_s2, 32, %s50_s30, [#allocation6]  }
  0x21   :  { %s4858_s1 = scalar_lea.hbm %s5903_s4, 16 }
  0x22   :  { %p4859_p8 = scmp.ne.s32.totalorder %s5903_s4, %s4858_s1  ;;  %p4862_p9 = scmp.lt.u32.totalorder %s4858_s1, %s5903_s4 }
  0x24   :  { %p4864_p10 = pnand %p4862_p9, %p4859_p8 }
  0x26   :  { %4867 = shalt.err (!%p4864_p10)
}
  0x27   :  { %s4868_s3 = scalar_lea.vmem %s70_s21, 16  ;;  %s4872_s26 = scalar_lea.vmem %s70_s21, 32 }
  0x28   :  { %p4869_p11 = scmp.ne.s32.totalorder %s70_s21, %s4868_s3  ;;  %p4873_p12 = scmp.lt.s32.totalorder %s70_s21, %s70_s21 }
  0x29   :  { %p4874_p13 = scmp.lt.s32.totalorder %s4872_s26, %s4868_s3 }
  0x2b   :  { %p4875_p0 = por %p4874_p13, %p4873_p12 }
  0x2d   :  { %p4876_p1 = pnand %p4875_p0, %p4869_p11 }
  0x2f   :  { %4879 = shalt.err (!%p4876_p1)
}
  0x30   :  { %72 = dma.hbm_to_vmem [thread:$0]  %s5903_s4, 16, %s70_s21, [#allocation9]  }
  0x31   :  { %s5024_s27 = smov [#allocation11]   ;;  %s5025_s29 = smov [#allocation2]  }
  0x32   :  { %s94_s28 = sshll.u32 %s5024_s27, 4  ;;  %s34_s0 = sshll.u32 %s5025_s29, 4  ;;  %s95_s28 = int_to_ptr.vmem [resolvable:$true] %s94_s28  ;;  %s5168_s0 = int_to_ptr.vmem [resolvable:$true] %s34_s0 }
  0x33   :  { %s4880_s22 = scalar_lea.hbm %s5907_s8, 32 }
  0x34   :  { %p4881_p2 = scmp.ne.s32.totalorder %s5907_s8, %s4880_s22  ;;  %p4884_p3 = scmp.lt.u32.totalorder %s4880_s22, %s5907_s8 }
  0x36   :  { %p4886_p4 = pnand %p4884_p3, %p4881_p2 }
  0x38   :  { %4889 = shalt.err (!%p4886_p4)
}
  0x39   :  { %s4890_s4 = scalar_lea.vmem %s95_s28, 32  ;;  %p4895_p6 = scmp.lt.s32.totalorder %s95_s28, %s95_s28 }
  0x3a   :  { %p4891_p5 = scmp.ne.s32.totalorder %s95_s28, %s4890_s4  ;;  %p4896_p7 = scmp.lt.s32.totalorder %s4890_s4, %s4890_s4 }
  0x3c   :  { %p4897_p8 = por %p4896_p7, %p4895_p6 }
  0x3e   :  { %p4898_p9 = pnand %p4897_p8, %p4891_p5 }
  0x40   :  { %4901 = shalt.err (!%p4898_p9)
}
  0x41   :  { %s5922_s21 = smov 16   ;;  %s5924_s26 = smov 1  }
  0x42   :  { %100 = dma.hbm_to_vmem [thread:$0]  %s5907_s8, 32, %s95_s28, [#allocation12], %s5922_s21, %s5922_s21, %s5924_s26  }
  0x43   :  { %s5933_s20 = sld [smem:[#allocation20_spill]] }
  0x49   :  { %s4902_s1 = scalar_lea.hbm %s5933_s20, 256 }
  0x4a   :  { %p4903_p10 = scmp.ne.s32.totalorder %s5933_s20, %s4902_s1  ;;  %p4906_p11 = scmp.lt.u32.totalorder %s4902_s1, %s5933_s20 }
  0x4c   :  { %p4908_p12 = pnand %p4906_p11, %p4903_p10 }
  0x4e   :  { %4911 = shalt.err (!%p4908_p12)
}
  0x4f   :  { %s4912_s3 = scalar_lea.vmem %s5168_s0, 256  ;;  %p4917_p0 = scmp.lt.s32.totalorder %s5168_s0, %s5168_s0 }
  0x50   :  { %p4913_p13 = scmp.ne.s32.totalorder %s5168_s0, %s4912_s3  ;;  %p4918_p1 = scmp.lt.s32.totalorder %s4912_s3, %s4912_s3 }
  0x52   :  { %p4919_p2 = por %p4918_p1, %p4917_p0 }
  0x54   :  { %p4920_p3 = pnand %p4919_p2, %p4913_p13 }
  0x56   :  { %4923 = shalt.err (!%p4920_p3)
}
  0x57   :  { %s5028_s8 = smov 128   ;;  %s5029_s28 = smov 8  }
  0x58   :  { %40 = dma.hbm_to_vmem [thread:$0]  %s5933_s20, 256, %s5168_s0, [#allocation3], %s5028_s8, %s5028_s8, %s5029_s28  }
  0x59   :  { %s5030_s2 = smov [#allocation7]   ;;  %s5031_s29 = smov [#allocation10]  }
  0x5a   :  { %s59_s27 = sshll.u32 %s5030_s2, 4  ;;  %s80_s1 = sshll.u32 %s5031_s29, 4  ;;  %s60_s27 = int_to_ptr.vmem [resolvable:$true] %s59_s27  ;;  %s5203_s1 = int_to_ptr.vmem [resolvable:$true] %s80_s1 }
  0x5b   :  { %s5934_s23 = sld [smem:[#allocation23_spill]] }
  0x61   :  { %s4924_s25 = scalar_lea.hbm %s5934_s23, 16 }
  0x62   :  { %p4925_p4 = scmp.ne.s32.totalorder %s5934_s23, %s4924_s25  ;;  %p4928_p5 = scmp.lt.u32.totalorder %s4924_s25, %s5934_s23 }
  0x64   :  { %p4930_p6 = pnand %p4928_p5, %p4925_p4 }
  0x66   :  { %4933 = shalt.err (!%p4930_p6)
}
  0x67   :  { %s4934_s0 = scalar_lea.vmem %s60_s27, 16  ;;  %s4938_s20 = scalar_lea.vmem %s60_s27, 32 }
  0x68   :  { %p4935_p7 = scmp.ne.s32.totalorder %s60_s27, %s4934_s0  ;;  %p4939_p8 = scmp.lt.s32.totalorder %s60_s27, %s60_s27 }
  0x69   :  { %p4940_p9 = scmp.lt.s32.totalorder %s4938_s20, %s4934_s0 }
  0x6b   :  { %p4941_p10 = por %p4940_p9, %p4939_p8 }
  0x6d   :  { %p4942_p11 = pnand %p4941_p10, %p4935_p7 }
  0x6f   :  { %4945 = shalt.err (!%p4942_p11)
}
  0x70   :  { %62 = dma.hbm_to_vmem [thread:$0]  %s5934_s23, 16, %s60_s27, [#allocation6]  }
  0x71   :  { %s4946_s2 = scalar_lea.hbm %s5905_s6, 32 }
  0x72   :  { %p4947_p12 = scmp.ne.s32.totalorder %s5905_s6, %s4946_s2  ;;  %p4950_p13 = scmp.lt.u32.totalorder %s4946_s2, %s5905_s6 }
  0x74   :  { %p4952_p0 = pnand %p4950_p13, %p4947_p12 }
  0x76   :  { %4955 = shalt.err (!%p4952_p0)
}
  0x77   :  { %s4956_s24 = scalar_lea.vmem %s5203_s1, 32  ;;  %p4961_p2 = scmp.lt.s32.totalorder %s5203_s1, %s5203_s1 }
  0x78   :  { %p4957_p1 = scmp.ne.s32.totalorder %s5203_s1, %s4956_s24  ;;  %p4962_p3 = scmp.lt.s32.totalorder %s4956_s24, %s4956_s24 }
  0x7a   :  { %p4963_p4 = por %p4962_p3, %p4961_p2 }
  0x7c   :  { %p4964_p5 = pnand %p4963_p4, %p4957_p1 }
  0x7e   :  { %4967 = shalt.err (!%p4964_p5)
}
  0x7f   :  { %s5935_s27 = smov 1   ;;  %s5936_s23 = smov 16  }
  0x80   :  { %86 = dma.hbm_to_vmem [thread:$0]  %s5905_s6, 32, %s5203_s1, [#allocation9], %s5936_s23, %s5936_s23, %s5935_s27  }
  0x81   :  { %s5032_s0 = smov [#allocation13]   ;;  %s4968_s21 = scalar_lea.hbm %s5908_s9, 32 }
  0x82   :  { %s106_s20 = sshll.u32 %s5032_s0, 4  ;;  %p4969_p6 = scmp.ne.s32.totalorder %s5908_s9, %s4968_s21  ;;  %s107_s20 = int_to_ptr.vmem [resolvable:$true] %s106_s20 }
  0x83   :  { %p4972_p7 = scmp.lt.u32.totalorder %s4968_s21, %s5908_s9 }
  0x85   :  { %p4974_p8 = pnand %p4972_p7, %p4969_p6 }
  0x87   :  { %4977 = shalt.err (!%p4974_p8)
}
  0x88   :  { %s4978_s29 = scalar_lea.vmem %s107_s20, 32  ;;  %p4983_p10 = scmp.lt.s32.totalorder %s107_s20, %s107_s20 }
  0x89   :  { %p4979_p9 = scmp.ne.s32.totalorder %s107_s20, %s4978_s29  ;;  %p4984_p11 = scmp.lt.s32.totalorder %s4978_s29, %s4978_s29 }
  0x8b   :  { %p4985_p12 = por %p4984_p11, %p4983_p10 }
  0x8d   :  { %p4986_p13 = pnand %p4985_p12, %p4979_p9 }
  0x8f   :  { %4989 = shalt.err (!%p4986_p13)
}
  0x90   :  { %112 = dma.hbm_to_vmem [thread:$0]  %s5908_s9, 32, %s107_s20, [#allocation12], %s5936_s23, %s5936_s23, %s5935_s27  }
  0x91   :  { %5012 = dma.done.wait [#allocation3], 256  }
  0x92   :  { %5013 = vsyncadd [#allocation3], 4294967040 }
  0x93   :  { %5014 = dma.done.wait [#allocation6], 48  }
  0x94   :  { %5015 = vsyncadd [#allocation6], 4294967248 }
  0x95   :  { %5016 = dma.done.wait [#allocation9], 48  }
  0x96   :  { %5017 = vsyncadd [#allocation9], 4294967248 }
  0x97   :  { %5018 = dma.done.wait [#allocation12], 64  }
  0x98   :  { %5019 = vsyncadd [#allocation12], 4294967232  ;;  %vm156_vm0 = vcmask 261120   ;;  %v152_v0 = vld [vmem:[#allocation2] sm:$0xff]  ;;  %v153_v1 = vld [vmem:[#allocation2 + $0x8] sm:$0xff]  ;;  %v5033_v37 = vmov 0.0   ;;  %v221_v62 = vlaneseq }
  0x99   :  { %v157_v2 = vsel %vm156_vm0, %v152_v0, 0.0  ;;  %v160_v3 = vsel %vm156_vm0, %v153_v1, 0.0  ;;  %v266_v14 = vld [vmem:[%s5904_s5] sm:$0xff]  ;;  %v267_v15 = vld [vmem:[%s5904_s5 + $0x8] sm:$0xff]  ;;  %v268_v16 = vld [vmem:[%s5904_s5 + $0x10] sm:$0xff]  ;;  %4370 = vmatprep.subr.mxu1 %v5033_v37  ;;  %vm5034_vm1 = vmmov 0  }
  0x9a   :  { %158 = vadd.xlane.f32.xlu0 %v157_v2  ;;  %v4634_v17 = vpack.c.bf16 %v267_v15, %v266_v14  ;;  %v269_v18 = vld [vmem:[%s5904_s5 + $0x18] sm:$0xff]  ;;  %v4125_v27 = vld [vmem:[#allocation7] ss:$0 sm:$0xff]  ;;  %v4126_v29 = vld [vmem:[#allocation8] ss:$0 sm:$0xff]  ;;  %4372 = vmatprep.mubr.msk.f32.mxu1 %vm5034_vm1, %v5033_v37  ;;  %s5035_s8 = smov 120  }
  0x9b   :  { %v4638_v19 = vpack.c.bf16 %v269_v18, %v268_v16  ;;  %v4127_v36 = vld [vmem:[#allocation10] ss:$0 sm:$0xff]  ;;  %s5036_s4 = smov 112   ;;  %s5037_s21 = smov 104   ;;  %vm374_vm2 = vcmask 64512   ;;  %vm210_vm3 = vcmask 1041408  }
  0x9c   :  { %4635 = vmatprep.subr.bf16.mxu0 %v4634_v17  ;;  %s5038_s30 = smov 96   ;;  %s5937_s26 = sld [smem:[#allocation21_spill]]  ;;  %v5039_v60 = vmov 1966171168   ;;  %vm212_vm4 = vcmask 1043456   ;;  %v222_v2 = vshrl.u32 %v221_v62, 7 }
  0x9d   :  { %4637 = vmatpush3.bf16.msra.mxu0 %v4634_v17  ;;  %v219_v61 = vunpack.c.l.s4 %v5039_v60  ;;  %vm214_vm5 = vcmask 1045504   ;;  %s5040_s29 = smov 64   ;;  %s5041_s0 = smov 24   ;;  %vm1759_vm6 = vcmask 130048   ;;  %vm1762_vm7 = vcmask 195584  }
  0x9e   :  { %161 = vadd.xlane.f32.xlu0 %v160_v3  ;;  %4639 = vmatprep.subr.bf16.mxu0 %v4638_v19  ;;  %vm2028_vm8 = vcmask 523264   ;;  %vm4028_vm9 = vcmask 1041409   ;;  %vm4105_vm10 = vcmask 254976  }
  0xa1   :  { %4641 = vmatpush3.bf16.msra.mxu0 %v4638_v19 }
  0xa2   :  { %4390 = vmatprep.subr.mxu0 %v5033_v37  ;;  %v200_v56 = vld [vmem:[%s5937_s26] sm:$0x3] }
  0xa3   :  { %v201_v57 = vsub.f32 1.0, %v200_v56 }
  0xa5   :  { %v202_v58 = vmul.f32 -10000.0, %v201_v57 }
  0xa7   :  { %v204_v59 = vrot.slane %v202_v58, 6  ;;  %v206_v63 = vrot.slane %v202_v58, 4  ;;  %v208_v3 = vrot.slane %v202_v58, 2 }
 0x127   :  { %v159_v4 = vpop.xlane.xlu0 %158 }
 0x128   :  { %v164_v5 = vmul.f32 0.03125, %v159_v4 }
 0x12a   :  { %v166_v6 = vsub.f32 %v152_v0, %v164_v5  ;;  %v211_v0 = vsel %vm210_vm3, %v202_v58, %v204_v59 }
 0x12b   :  { %v162_v7 = vpop.xlane.xlu0 %161  ;;  %v213_v4 = vsel %vm212_vm4, %v211_v0, %v206_v63 }
 0x12c   :  { %v165_v8 = vmul.f32 0.03125, %v162_v7  ;;  %v168_v9 = vmul.f32 %v166_v6, %v166_v6 }
 0x12e   :  { %v167_v10 = vsub.f32 %v153_v1, %v165_v8  ;;  %v170_v11 = vsel %vm156_vm0, %v168_v9, 0.0  ;;  %v220_v1 = vunpack.c.0.s8 %v219_v61  ;;  %v991_v9 = vsub.s32 0, %v222_v2 }
 0x12f   :  { %171 = vadd.xlane.f32.xlu1 %v170_v11 }
 0x130   :  { %v169_v12 = vmul.f32 %v167_v10, %v167_v10  ;;  %v223_v5 = vsub.s32 %v220_v1, %v222_v2 }
 0x132   :  { %v173_v13 = vsel %vm156_vm0, %v169_v12, 0.0 }
 0x133   :  { %174 = vadd.xlane.f32.xlu1 %v173_v13 }
 0x1bc   :  { %v172_v20 = vpop.xlane.xlu1 %171 }
 0x1bd   :  { %v176_v21 = vmul.f32 0.03125, %v172_v20 }
 0x1bf   :  { %v178_v22 = vadd.f32 1e-12, %v176_v21 }
 0x1c0   :  { %v175_v23 = vpop.xlane.xlu1 %174 }
 0x1c1   :  { %4742 = vrsqrt.f32 %v178_v22  ;;  %v177_v24 = vmul.f32 0.03125, %v175_v23 }
 0x1c3   :  { %v179_v25 = vadd.f32 1e-12, %v177_v24 }
 0x1c5   :  { %4744 = vrsqrt.f32 %v179_v25 }
 0x1cb   :  { %v4743_v26 = vpop.eup %4742 }
 0x1cc   :  { %v182_v28 = vmul.f32 %v4743_v26, %v166_v6  ;;  %v215_v6 = vsel %vm214_vm5, %v213_v4, %v208_v3 }
 0x1cd   :  { %v224_v7 = vrot.slane %v215_v6, %v223_v5  ;;  %v217_v24 = vcombine.high %v215_v6, %v215_v6 }
 0x1ce   :  { %v190_v30 = vmul.f32 %v4125_v27, %v182_v28 }
 0x1cf   :  { %v4745_v31 = vpop.eup %4744  ;;  %v240_v8 = vrot.slane %v224_v7, %v223_v5  ;;  %v231_v26 = vrot.slane %v217_v24, %v223_v5 }
 0x1d0   :  { %v183_v32 = vmul.f32 %v4745_v31, %v167_v10  ;;  %v5268_v33 = vadd.f32 %v4126_v29, %v190_v30  ;;  %v232_v10 = vcombine.high %v224_v7, %v224_v7 }
 0x1d1   :  { %v5377_v11 = vrot.slane %v240_v8, %v991_v9  ;;  %v262_v25 = vcombine.high %v240_v8, %v240_v8 }
 0x1d2   :  { %v191_v34 = vmul.f32 %v4125_v27, %v183_v32  ;;  %4367 = vmatprep.mubr.msk.f32.mxu0 %vm156_vm0, %v5268_v33  ;;  %v254_v15 = vrot.slane %v232_v10, %v223_v5 }
 0x1d3   :  { %v5391_v27 = vrot.slane %v262_v25, %v991_v9 }
 0x1d4   :  { %v5272_v35 = vadd.f32 %v4126_v29, %v191_v34  ;;  %v5384_v18 = vrot.slane %v254_v15, %v991_v9  ;;  %v264_v28 = vcombine.high %v254_v15, %v254_v15  ;;  %v233_v29 = vcombine.high %v231_v26, %v231_v26 }
 0x1d5   :  { %v247_v34 = vrot.slane %v231_v26, %v223_v5 }
 0x1d6   :  { %4368 = vmatmul.mubr.msk.f32.vlgmr.msra.gmra.mrb[0].mxu0 %vm156_vm0, %v5272_v35 }
 0x1d7   :  { %4392 = vmatprep.mubr.msk.f32.mxu0 %vm5034_vm1, %v5033_v37  ;;  %v263_v56 = vcombine.high %v247_v34, %v247_v34 }
 0x1d9   :  { %v5407_v4 = vrot.slane %v263_v56, %v991_v9 }
 0x2a9   :  { %v4369_v38 = vpop.f32.mrb[0].mxu0 }
 0x2aa   :  { %v5282_v39 = vadd.f32 %v4369_v38, %v4127_v36  ;;  %v349_v40 = vpop.f32.mrb[1].mxu0  ;;  %v5396_v38 = vrot.slane %v264_v28, %v991_v9 }
 0x2ab   :  { %v5284_v41 = vadd.f32 %v4127_v36, %v349_v40  ;;  %v261_v40 = vrot.slane %v233_v29, %v223_v5 }
 0x2ac   :  { %362 = vrot.lane.b32.xlu1 %v5282_v39, %s5035_s8 }
 0x2ad   :  { %360 = vrot.lane.b32.xlu0 %v5284_v41, %s5035_s8  ;;  %v5403_v58 = vrot.slane %v261_v40, %v991_v9  ;;  %v265_v59 = vcombine.high %v261_v40, %v261_v40 }
 0x2af   :  { %v5410_v6 = vrot.slane %v265_v59, %v991_v9 }
 0x2b0   :  { %364 = vrot.lane.b32.xlu1 %v5284_v41, %s5036_s4 }
 0x2b1   :  { %368 = vrot.lane.b32.xlu0 %v5284_v41, %s5037_s21 }
 0x2b4   :  { %366 = vrot.lane.b32.xlu1 %v5282_v39, %s5036_s4 }
 0x2b5   :  { %372 = vrot.lane.b32.xlu0 %v5284_v41, %s5038_s30 }
 0x2b8   :  { %370 = vrot.lane.b32.xlu1 %v5282_v39, %s5037_s21 }
 0x2bc   :  { %449 = vrot.lane.b32.xlu1 %v5282_v39, %s5038_s30 }
 0x31e   :  { %v5302_v42 = vpop.permute.xlu1 %362 }
 0x31f   :  { %601 = vrot.lane.b32.xlu1 %v5302_v42, %s5038_s30  ;;  %v5306_v43 = vpop.permute.xlu0 %360 }
 0x320   :  { %525 = vrot.lane.b32.xlu0 %v5306_v43, %s5038_s30 }
 0x322   :  { %v5310_v44 = vpop.permute.xlu1 %364 }
 0x323   :  { %v5312_v45 = vpop.permute.xlu0 %368 }
 0x324   :  { %677 = vrot.lane.b32.xlu0 %v5310_v44, %s5038_s30 }
 0x326   :  { %v5316_v46 = vpop.permute.xlu1 %366 }
 0x327   :  { %753 = vrot.lane.b32.xlu1 %v5316_v46, %s5038_s30  ;;  %v373_v47 = vpop.permute.xlu0 %372 }
 0x328   :  { %829 = vrot.lane.b32.xlu0 %v5312_v45, %s5038_s30  ;;  %4371 = vmatpush3.xpose.msk.msra.mxu1 %vm374_vm2, %v373_v47 }
 0x329   :  { %4375 = vmatprep.subr.mxu1 %v5033_v37 }
 0x32a   :  { %v5324_v48 = vpop.permute.xlu1 %370 }
 0x32b   :  { %905 = vrot.lane.b32.xlu1 %v5324_v48, %s5038_s30  ;;  %4373 = vmatmul.mubr.msk.f32.vlgmr.msra.gmra.mrb[0].mxu1 %vm374_vm2, %v5284_v41 }
 0x32c   :  { %4377 = vmatprep.mubr.msk.f32.mxu1 %vm5034_vm1, %v5033_v37 }
 0x32e   :  { %v450_v49 = vpop.permute.xlu1 %449 }
 0x32f   :  { %4376 = vmatpush3.xpose.msk.msra.mxu1 %vm374_vm2, %v450_v49 }
 0x330   :  { %4380 = vmatprep.subr.mxu1 %v5033_v37 }
 0x332   :  { %4378 = vmatmul.mubr.msk.f32.vlgmr.msra.gmra.mrb[2].mxu1 %vm374_vm2, %v5282_v39 }
 0x333   :  { %4382 = vmatprep.mubr.msk.f32.mxu1 %vm5034_vm1, %v5033_v37 }
 0x391   :  { %v602_v51 = vpop.permute.xlu1 %601 }
 0x392   :  { %v526_v50 = vpop.permute.xlu0 %525 }
 0x393   :  { %4381 = vmatpush3.xpose.msk.msra.mxu1 %vm374_vm2, %v526_v50 }
 0x394   :  { %4385 = vmatprep.subr.mxu1 %v5033_v37 }
 0x396   :  { %4383 = vmatmul.mubr.msk.f32.vlgmr.msra.gmra.mrb[4].mxu1 %vm374_vm2, %v5306_v43  ;;  %v678_v52 = vpop.permute.xlu0 %677 }
 0x397   :  { %4386 = vmatpush3.xpose.msk.msra.mxu1 %vm374_vm2, %v602_v51  ;;  %4391 = vmatpush3.xpose.msk.msra.mxu0 %vm374_vm2, %v678_v52 }
 0x398   :  { %4387 = vmatprep.mubr.msk.f32.mxu1 %vm5034_vm1, %v5033_v37  ;;  %4395 = vmatprep.subr.mxu1 %v5033_v37 }
 0x399   :  { %v754_v53 = vpop.permute.xlu1 %753  ;;  %4400 = vmatprep.subr.mxu0 %v5033_v37 }
 0x39a   :  { %4388 = vmatmul.mubr.msk.f32.vlgmr.msra.gmra.mrb[6].mxu1 %vm374_vm2, %v5302_v42  ;;  %4393 = vmatmul.mubr.msk.f32.vlgmr.msra.gmra.mrb[2].mxu0 %vm374_vm2, %v5310_v44  ;;  %v830_v54 = vpop.permute.xlu0 %829 }
 0x39b   :  { %4396 = vmatpush3.xpose.msk.msra.mxu1 %vm374_vm2, %v754_v53  ;;  %4401 = vmatpush3.xpose.msk.msra.mxu0 %vm374_vm2, %v830_v54 }
 0x39c   :  { %4397 = vmatprep.mubr.msk.f32.mxu1 %vm5034_vm1, %v5033_v37  ;;  %4402 = vmatprep.mubr.msk.f32.mxu0 %vm5034_vm1, %v5033_v37 }
 0x39d   :  { %v906_v55 = vpop.permute.xlu1 %905  ;;  %4405 = vmatprep.subr.mxu1 %v5033_v37  ;;  %4410 = vmatprep.subr.mxu0 %v5033_v37 }
 0x39e   :  { %4398 = vmatmul.mubr.msk.f32.vlgmr.msra.gmra.mrb[8].mxu1 %vm374_vm2, %v5316_v46  ;;  %4403 = vmatmul.mubr.msk.f32.vlgmr.msra.gmra.mrb[4].mxu0 %vm374_vm2, %v5312_v45 }
 0x39f   :  { %4406 = vmatpush3.xpose.msk.msra.mxu1 %vm374_vm2, %v906_v55  ;;  %4407 = vmatprep.mubr.msk.f32.mxu1 %vm5034_vm1, %v5033_v37  ;;  %v5400_v55 = vrot.slane %v247_v34, %v991_v9 }
 0x3a0   :  { %4415 = vmatprep.subr.mxu1 %v5033_v37  ;;  %4412 = vmatprep.mubr.msk.f32.mxu0 %vm5034_vm1, %v5033_v37 }
 0x3a2   :  { %4408 = vmatmul.mubr.msk.f32.vlgmr.msra.gmra.mrb[10].mxu1 %vm374_vm2, %v5324_v48 }
 0x3a3   :  { %4417 = vmatprep.mubr.msk.f32.mxu1 %vm5034_vm1, %v5033_v37 }
 0x3fe   :  { %v445_v12 = vpop.f32.mrb[0].mxu1 }
 0x3ff   :  { %v981_v13 = vmul.f32 0.35355338, %v445_v12  ;;  %v4374_v14 = vpop.f32.mrb[1].mxu1 }
 0x401   :  { %v5380_v16 = vadd.f32 %v5377_v11, %v981_v13 }
 0x403   :  { %v1037_v17 = vsel %vm374_vm2, %v5380_v16, -inf }
 0x404   :  { %1038 = vmax.xlane.f32.xlu0 %v1037_v17 }
 0x405   :  { %v521_v19 = vpop.f32.mrb[2].mxu1 }
 0x406   :  { %v982_v20 = vmul.f32 0.35355338, %v521_v19  ;;  %v4379_v21 = vpop.f32.mrb[3].mxu1 }
 0x408   :  { %v5387_v22 = vadd.f32 %v5384_v18, %v982_v20 }
 0x40a   :  { %v1040_v23 = vsel %vm374_vm2, %v5387_v22, -inf }
 0x40b   :  { %1041 = vmax.xlane.f32.xlu1 %v1040_v23 }
 0x469   :  { %v597_v30 = vpop.f32.mrb[4].mxu1 }
 0x46a   :  { %v983_v31 = vmul.f32 0.35355338, %v597_v30  ;;  %v4384_v32 = vpop.f32.mrb[5].mxu1 }
 0x46c   :  { %v5394_v36 = vadd.f32 %v5391_v27, %v983_v31 }
 0x46d   :  { %v673_v47 = vpop.f32.mrb[6].mxu1  ;;  %v749_v49 = vpop.f32.mrb[2].mxu0 }
 0x46e   :  { %v984_v50 = vmul.f32 0.35355338, %v673_v47  ;;  %v4389_v51 = vpop.f32.mrb[7].mxu1  ;;  %v4394_v52 = vpop.f32.mrb[3].mxu0  ;;  %v985_v53 = vmul.f32 0.35355338, %v749_v49 }
 0x46f   :  { %v1043_v54 = vsel %vm374_vm2, %v5394_v36, -inf }
 0x470   :  { %1044 = vmax.xlane.f32.xlu0 %v1043_v54  ;;  %v1032_v57 = vadd.f32 %v5396_v38, %v984_v50  ;;  %v1033_v3 = vadd.f32 %v5400_v55, %v985_v53 }
 0x471   :  { %v825_v60 = vpop.f32.mrb[8].mxu1  ;;  %v901_v61 = vpop.f32.mrb[4].mxu0 }
 0x472   :  { %v986_v62 = vmul.f32 0.35355338, %v825_v60  ;;  %v4399_v63 = vpop.f32.mrb[9].mxu1  ;;  %v4404_v0 = vpop.f32.mrb[5].mxu0  ;;  %v987_v1 = vmul.f32 0.35355338, %v901_v61 }
 0x473   :  { %v1046_v2 = vsel %vm374_vm2, %v1032_v57, -inf  ;;  %v1049_v13 = vsel %vm374_vm2, %v1033_v3, -inf }
 0x474   :  { %1047 = vmax.xlane.f32.xlu0 %v1046_v2  ;;  %v1034_v5 = vadd.f32 %v5403_v58, %v986_v62  ;;  %v1035_v14 = vadd.f32 %v5407_v4, %v987_v1 }
 0x475   :  { %v977_v7 = vpop.f32.mrb[10].mxu1 }
 0x476   :  { %v988_v8 = vmul.f32 0.35355338, %v977_v7  ;;  %v4409_v10 = vpop.f32.mrb[11].mxu1  ;;  %v1052_v12 = vsel %vm374_vm2, %v1034_v5, -inf  ;;  %v1055_v19 = vsel %vm374_vm2, %v1035_v14, -inf }
 0x477   :  { %1053 = vmax.xlane.f32.xlu1 %v1052_v12 }
 0x478   :  { %1050 = vmax.xlane.f32.xlu0 %v1049_v13  ;;  %v1036_v15 = vadd.f32 %v5410_v6, %v988_v8 }
 0x47a   :  { %v1058_v17 = vsel %vm374_vm2, %v1036_v15, -inf }
 0x47b   :  { %1059 = vmax.xlane.f32.xlu1 %v1058_v17 }
 0x47c   :  { %1056 = vmax.xlane.f32.xlu0 %v1055_v19 }
 0x48c   :  { %1201 = vrot.lane.b32.xlu1 %v5282_v39, %s5040_s29 }
 0x490   :  { %1277 = vrot.lane.b32.xlu1 %v5306_v43, %s5040_s29 }
 0x491   :  { %v1039_v9 = vpop.xlane.xlu0 %1038 }
 0x492   :  { %1125 = vrot.lane.b32.xlu0 %v5284_v41, %s5040_s29  ;;  %v1061_v20 = vsub.f32 %v5380_v16, %v1039_v9 }
 0x494   :  { %1353 = vrot.lane.b32.xlu1 %v5302_v42, %s5040_s29  ;;  %v1069_v21 = vmul.f32 1.442695, %v1061_v20 }
 0x496   :  { %1429 = vrot.lane.b32.xlu0 %v5310_v44, %s5040_s29  ;;  %4746 = vpow2.f32 %v1069_v21 }
 0x498   :  { %1505 = vrot.lane.b32.xlu1 %v5316_v46, %s5040_s29  ;;  %v1042_v39 = vpop.xlane.xlu1 %1041 }
 0x499   :  { %v1062_v23 = vsub.f32 %v5387_v22, %v1042_v39 }
 0x49b   :  { %v1071_v43 = vmul.f32 1.442695, %v1062_v23 }
 0x49d   :  { %4748 = vpow2.f32 %v1071_v43 }
 0x4a0   :  { %v5432_v41 = vpop.eup %4746 }
 0x4a1   :  { %v1085_v42 = vsel %vm374_vm2, %v5432_v41, 0.0 }
 0x4a7   :  { %v5436_v44 = vpop.eup %4748 }
 0x4a8   :  { %v1088_v46 = vsel %vm374_vm2, %v5436_v44, 0.0 }
 0x4b5   :  { %1086 = vadd.xlane.f32.xlu0 %v1085_v42 }
 0x4bc   :  { %1089 = vadd.xlane.f32.xlu1 %v1088_v46 }
 0x4fd   :  { %v1045_v16 = vpop.xlane.xlu0 %1044 }
 0x4fe   :  { %v1063_v24 = vsub.f32 %v5394_v36, %v1045_v16 }
 0x500   :  { %v1073_v25 = vmul.f32 1.442695, %v1063_v24 }
 0x501   :  { %v1048_v22 = vpop.xlane.xlu0 %1047 }
 0x502   :  { %4750 = vpow2.f32 %v1073_v25  ;;  %v1064_v26 = vsub.f32 %v1032_v57, %v1048_v22 }
 0x504   :  { %v1075_v28 = vmul.f32 1.442695, %v1064_v26  ;;  %v1054_v29 = vpop.xlane.xlu1 %1053 }
 0x505   :  { %v1066_v30 = vsub.f32 %v1034_v5, %v1054_v29  ;;  %v1051_v31 = vpop.xlane.xlu0 %1050 }
 0x506   :  { %4752 = vpow2.f32 %v1075_v28  ;;  %v1065_v32 = vsub.f32 %v1033_v3, %v1051_v31 }
 0x507   :  { %v1079_v34 = vmul.f32 1.442695, %v1066_v30 }
 0x508   :  { %v1077_v40 = vmul.f32 1.442695, %v1065_v32  ;;  %v1060_v47 = vpop.xlane.xlu1 %1059 }
 0x509   :  { %4754 = vpow2.f32 %v1079_v34  ;;  %v1068_v49 = vsub.f32 %v1036_v15, %v1060_v47  ;;  %v1057_v50 = vpop.xlane.xlu0 %1056 }
 0x50a   :  { %4756 = vpow2.f32 %v1077_v40  ;;  %v1067_v51 = vsub.f32 %v1035_v14, %v1057_v50  ;;  %v1766_v50 = vld [vmem:[%s5906_s7 + $0x8] sm:$0xff] }
 0x50b   :  { %v1083_v52 = vmul.f32 1.442695, %v1068_v49  ;;  %v1765_v49 = vld [vmem:[%s5906_s7] sm:$0xff] }
 0x50c   :  { %v4751_v36 = vpop.eup %4750  ;;  %v1081_v53 = vmul.f32 1.442695, %v1067_v51  ;;  %v1202_v54 = vpop.permute.xlu1 %1201  ;;  %v4642_v51 = vpack.c.bf16 %v1766_v50, %v1765_v49 }
 0x50d   :  { %4758 = vpow2.f32 %v1083_v52  ;;  %v1126_v56 = vpop.permute.xlu0 %1125  ;;  %4416 = vmatpush3.msra.mxu1 %v1202_v54  ;;  %v1091_v57 = vsel %vm374_vm2, %v4751_v36, 0.0  ;;  %v1767_v52 = vld [vmem:[%s5906_s7 + $0x10] sm:$0xff] }
 0x50e   :  { %4760 = vpow2.f32 %v1081_v53  ;;  %1092 = vadd.xlane.f32.xlu0 %v1091_v57  ;;  %4411 = vmatpush3.msra.mxu0 %v1126_v56 }
 0x50f   :  { %4420 = vmatprep.subr.mxu0 %v5033_v37  ;;  %4425 = vmatprep.subr.mxu1 %v5033_v37 }
 0x510   :  { %v4753_v59 = vpop.eup %4752  ;;  %v1278_v7 = vpop.permute.xlu1 %1277 }
 0x511   :  { %v1094_v60 = vsel %vm374_vm2, %v4753_v59, 0.0  ;;  %v1430_v8 = vpop.permute.xlu0 %1429 }
 0x512   :  { %1095 = vadd.xlane.f32.xlu1 %v1094_v60 }
 0x513   :  { %v4755_v61 = vpop.eup %4754 }
 0x514   :  { %v4757_v62 = vpop.eup %4756  ;;  %v1100_v63 = vsel %vm374_vm2, %v4755_v61, 0.0  ;;  %v1354_v10 = vpop.permute.xlu1 %1353 }
 0x515   :  { %v1097_v0 = vsel %vm374_vm2, %v4757_v62, 0.0 }
 0x516   :  { %1101 = vadd.xlane.f32.xlu1 %v1100_v63  ;;  %1098 = vadd.xlane.f32.xlu0 %v1097_v0 }
 0x517   :  { %v5447_v1 = vpop.eup %4758 }
 0x518   :  { %v5449_v2 = vpop.eup %4760  ;;  %v1106_v3 = vsel %vm374_vm2, %v5447_v1, 0.0  ;;  %v1506_v13 = vpop.permute.xlu1 %1505 }
 0x519   :  { %v1103_v5 = vsel %vm374_vm2, %v5449_v2, 0.0 }
 0x51a   :  { %1107 = vadd.xlane.f32.xlu1 %v1106_v3  ;;  %1104 = vadd.xlane.f32.xlu0 %v1103_v5 }
 0x52b   :  { %1657 = vrot.lane.b32.xlu1 %v5324_v48, %s5040_s29 }
 0x530   :  { %1581 = vrot.lane.b32.xlu0 %v5312_v45, %s5040_s29 }
 0x542   :  { %v1087_v12 = vpop.xlane.xlu0 %1086 }
 0x543   :  { %4762 = vrcp.f32 %v1087_v12 }
 0x549   :  { %v1090_v14 = vpop.xlane.xlu1 %1089 }
 0x54a   :  { %4764 = vrcp.f32 %v1090_v14 }
 0x54d   :  { %v4763_v15 = vpop.eup %4762 }
 0x54e   :  { %v1110_v17 = vmul.f32 %v4763_v15, %v5432_v41 }
 0x550   :  { %4413 = vmatmul.mubr.msk.f32.vlgmr.msra.gmra.mrb[6].mxu0 %vm374_vm2, %v1110_v17 }
 0x551   :  { %4421 = vmatpush3.msra.mxu0 %v1278_v7  ;;  %4422 = vmatprep.mubr.msk.f32.mxu0 %vm5034_vm1, %v5033_v37 }
 0x552   :  { %4430 = vmatprep.subr.mxu0 %v5033_v37 }
 0x554   :  { %v4765_v45 = vpop.eup %4764 }
 0x555   :  { %v1112_v48 = vmul.f32 %v4765_v45, %v5436_v44 }
 0x557   :  { %4418 = vmatmul.mubr.msk.f32.vlgmr.msra.gmra.mrb[12].mxu1 %vm374_vm2, %v1112_v48 }
 0x558   :  { %4426 = vmatpush3.msra.mxu1 %v1354_v10  ;;  %4427 = vmatprep.mubr.msk.f32.mxu1 %vm5034_vm1, %v5033_v37 }
 0x559   :  { %4435 = vmatprep.subr.mxu1 %v5033_v37 }
 0x59b   :  { %v1093_v19 = vpop.xlane.xlu0 %1092 }
 0x59c   :  { %4766 = vrcp.f32 %v1093_v19 }
 0x59f   :  { %v1096_v9 = vpop.xlane.xlu1 %1095 }
 0x5a0   :  { %4768 = vrcp.f32 %v1096_v9  ;;  %v4154_v9 = vld [vmem:[#allocation11] ss:$0 sm:$0xff] }
 0x5a3   :  { %v1102_v20 = vpop.xlane.xlu1 %1101  ;;  %v1099_v21 = vpop.xlane.xlu0 %1098 }
 0x5a4   :  { %4770 = vrcp.f32 %v1102_v20 }
 0x5a5   :  { %4772 = vrcp.f32 %v1099_v21 }
 0x5a6   :  { %v4767_v39 = vpop.eup %4766 }
 0x5a7   :  { %v1114_v23 = vmul.f32 %v4767_v39, %v4751_v36  ;;  %v1108_v43 = vpop.xlane.xlu1 %1107  ;;  %v1105_v41 = vpop.xlane.xlu0 %1104  ;;  %v1768_v36 = vld [vmem:[%s5906_s7 + $0x18] sm:$0xff] }
 0x5a8   :  { %4774 = vrcp.f32 %v1108_v43  ;;  %v4646_v53 = vpack.c.bf16 %v1768_v36, %v1767_v52 }
 0x5a9   :  { %4776 = vrcp.f32 %v1105_v41  ;;  %4423 = vmatmul.mubr.msk.f32.vlgmr.msra.gmra.mrb[8].mxu0 %vm374_vm2, %v1114_v23 }
 0x5aa   :  { %v4769_v42 = vpop.eup %4768  ;;  %4431 = vmatpush3.msra.mxu0 %v1430_v8  ;;  %4432 = vmatprep.mubr.msk.f32.mxu0 %vm5034_vm1, %v5033_v37 }
 0x5ab   :  { %v1116_v44 = vmul.f32 %v4769_v42, %v4753_v59  ;;  %4440 = vmatprep.subr.mxu0 %v5033_v37  ;;  %v1658_v22 = vpop.permute.xlu1 %1657  ;;  %v1582_v28 = vpop.permute.xlu0 %1581 }
 0x5ad   :  { %4428 = vmatmul.mubr.msk.f32.vlgmr.msra.gmra.mrb[14].mxu1 %vm374_vm2, %v1116_v44 }
 0x5ae   :  { %v4771_v46 = vpop.eup %4770  ;;  %4436 = vmatpush3.msra.mxu1 %v1506_v13  ;;  %4437 = vmatprep.mubr.msk.f32.mxu1 %vm5034_vm1, %v5033_v37 }
 0x5af   :  { %v4773_v16 = vpop.eup %4772  ;;  %v1120_v24 = vmul.f32 %v4771_v46, %v4755_v61  ;;  %4445 = vmatprep.subr.mxu1 %v5033_v37 }
 0x5b0   :  { %v1118_v25 = vmul.f32 %v4773_v16, %v4757_v62 }
 0x5b1   :  { %4438 = vmatmul.mubr.msk.f32.vlgmr.msra.gmra.mrb[16].mxu1 %vm374_vm2, %v1120_v24 }
 0x5b2   :  { %v4775_v26 = vpop.eup %4774  ;;  %4433 = vmatmul.mubr.msk.f32.vlgmr.msra.gmra.mrb[10].mxu0 %vm374_vm2, %v1118_v25  ;;  %4446 = vmatpush3.msra.mxu1 %v1658_v22 }
 0x5b3   :  { %v4777_v29 = vpop.eup %4776  ;;  %v1124_v30 = vmul.f32 %v4775_v26, %v5447_v1  ;;  %4441 = vmatpush3.msra.mxu0 %v1582_v28  ;;  %4442 = vmatprep.mubr.msk.f32.mxu0 %vm5034_vm1, %v5033_v37 }
 0x5b4   :  { %v1122_v31 = vmul.f32 %v4777_v29, %v5449_v2  ;;  %4447 = vmatprep.mubr.msk.f32.mxu1 %vm5034_vm1, %v5033_v37  ;;  %4643 = vmatprep.subr.bf16.mxu0 %v4642_v51 }
 0x5b5   :  { %4448 = vmatmul.mubr.msk.f32.vlgmr.msra.gmra.mrb[18].mxu1 %vm374_vm2, %v1124_v30 }
 0x5b6   :  { %4443 = vmatmul.mubr.msk.f32.vlgmr.msra.gmra.mrb[12].mxu0 %vm374_vm2, %v1122_v31  ;;  %v1904_v31 = vld [vmem:[%s5910_s11 + $0x8] sm:$0xff] }
 0x5b7   :  { %4645 = vmatpush3.bf16.msra.mxu0 %v4642_v51 }
 0x5b8   :  { %4647 = vmatprep.subr.bf16.mxu0 %v4646_v53 }
 0x5bb   :  { %4649 = vmatpush3.bf16.msra.mxu0 %v4646_v53 }
 0x623   :  { %v1197_v32 = vpop.f32.mrb[6].mxu0 }
 0x624   :  { %v4414_v34 = vpop.f32.mrb[7].mxu0 }
 0x625   :  { %v1905_v34 = vld [vmem:[%s5910_s11 + $0x10] sm:$0xff] }
 0x62a   :  { %v1273_v40 = vpop.f32.mrb[12].mxu1 }
 0x62b   :  { %v4419_v47 = vpop.f32.mrb[13].mxu1 }
 0x67c   :  { %v1349_v54 = vpop.f32.mrb[8].mxu0 }
 0x67d   :  { %1735 = vrot.lane.b32.xlu0 %v1349_v54, %s5029_s28  ;;  %v4424_v56 = vpop.f32.mrb[9].mxu0 }
 0x67e   :  { %v4157_v56 = vld [vmem:[#allocation13] ss:$0 sm:$0xff] }
 0x680   :  { %v1425_v57 = vpop.f32.mrb[14].mxu1 }
 0x681   :  { %1737 = vrot.lane.b32.xlu1 %v1425_v57, %s5029_s28  ;;  %v4429_v59 = vpop.f32.mrb[15].mxu1 }
 0x682   :  { %v4158_v59 = vld [vmem:[%s5909_s10] ss:$0 sm:$0xff] }
 0x684   :  { %v1577_v60 = vpop.f32.mrb[16].mxu1 }
 0x685   :  { %v1501_v61 = vpop.f32.mrb[10].mxu0  ;;  %1745 = vrot.lane.b32.xlu1 %v1577_v60, %s5936_s23  ;;  %v4439_v62 = vpop.f32.mrb[17].mxu1 }
 0x686   :  { %1743 = vrot.lane.b32.xlu0 %v1501_v61, %s5936_s23  ;;  %v4434_v63 = vpop.f32.mrb[11].mxu0 }
 0x688   :  { %v1729_v0 = vpop.f32.mrb[18].mxu1 }
 0x689   :  { %v1653_v1 = vpop.f32.mrb[12].mxu0  ;;  %1753 = vrot.lane.b32.xlu1 %v1729_v0, %s5041_s0  ;;  %v4449_v2 = vpop.f32.mrb[19].mxu1 }
 0x68a   :  { %1751 = vrot.lane.b32.xlu0 %v1653_v1, %s5041_s0  ;;  %v4444_v3 = vpop.f32.mrb[13].mxu0  ;;  %v2013_v2 = vld [vmem:[%s5912_s13] sm:$0xff] }
 0x68b   :  { %v2014_v3 = vld [vmem:[%s5912_s13 + $0x8] sm:$0xff] }
 0x6ef   :  { %v1736_v7 = vpop.permute.xlu0 %1735 }
 0x6f0   :  { %v1757_v13 = vsel %vm374_vm2, %v1197_v32, %v1736_v7  ;;  %v2015_v7 = vld [vmem:[%s5912_s13 + $0x10] sm:$0xff] }
 0x6f3   :  { %v1738_v5 = vpop.permute.xlu1 %1737 }
 0x6f4   :  { %v1758_v12 = vsel %vm374_vm2, %v1273_v40, %v1738_v5  ;;  %v1906_v40 = vld [vmem:[%s5910_s11 + $0x18] sm:$0xff]  ;;  %v4658_v5 = vpack.c.bf16 %v2014_v3, %v2013_v2  ;;  %v4168_v2 = vld [vmem:[%s5904_s5 + $0x28] sm:$0xff] }
 0x6f5   :  { %v4654_v47 = vpack.c.bf16 %v1906_v40, %v1905_v34 }
 0x6f6   :  { %4659 = vmatprep.subr.bf16.mxu0 %v4658_v5 }
 0x6f7   :  { %v1746_v8 = vpop.permute.xlu1 %1745 }
 0x6f8   :  { %v1744_v10 = vpop.permute.xlu0 %1743  ;;  %v1761_v14 = vsel %vm1759_vm6, %v1758_v12, %v1746_v8  ;;  %v2016_v8 = vld [vmem:[%s5912_s13 + $0x18] sm:$0xff]  ;;  %v2017_v12 = vld [vmem:[%s5912_s13 + $0x20] sm:$0xff] }
 0x6f9   :  { %v1760_v17 = vsel %vm1759_vm6, %v1757_v13, %v1744_v10  ;;  %v4662_v10 = vpack.c.bf16 %v2016_v8, %v2015_v7  ;;  %v2018_v13 = vld [vmem:[%s5912_s13 + $0x28] sm:$0xff]  ;;  %v4170_v7 = vld [vmem:[%s5904_s5 + $0x38] sm:$0xff] }
 0x6fb   :  { %v1754_v15 = vpop.permute.xlu1 %1753 }
 0x6fc   :  { %v1764_v45 = vsel %vm1762_vm7, %v1761_v14, %v1754_v15  ;;  %v1752_v48 = vpop.permute.xlu0 %1751  ;;  %v4666_v14 = vpack.c.bf16 %v2018_v13, %v2017_v12  ;;  %v2019_v15 = vld [vmem:[%s5912_s13 + $0x30] sm:$0xff] }
 0x6fd   :  { %v1763_v19 = vsel %vm1762_vm7, %v1760_v17, %v1752_v48  ;;  %v2020_v17 = vld [vmem:[%s5912_s13 + $0x38] sm:$0xff]  ;;  %v4159_v48 = vld [vmem:[%s5911_s12] ss:$0 sm:$0xff] }
 0x6fe   :  { %4458 = vmatprep.mubr.msk.f32.mxu0 %vm156_vm0, %v1763_v19 }
 0x6ff   :  { %4459 = vmatmul.mubr.msk.f32.vlgmr.msra.gmra.mrb[14].mxu0 %vm156_vm0, %v1764_v45  ;;  %v4670_v45 = vpack.c.bf16 %v2020_v17, %v2019_v15 }
 0x700   :  { %4661 = vmatpush3.bf16.msra.mxu0 %v4658_v5  ;;  %v4169_v5 = vld [vmem:[%s5904_s5 + $0x30] sm:$0xff] }
 0x701   :  { %4663 = vmatprep.subr.bf16.mxu0 %v4662_v10  ;;  %v4678_v8 = vpack.c.bf16 %v4170_v7, %v4169_v5 }
 0x704   :  { %4665 = vmatpush3.bf16.msra.mxu0 %v4662_v10 }
 0x705   :  { %4667 = vmatprep.subr.bf16.mxu0 %v4666_v14 }
 0x708   :  { %4669 = vmatpush3.bf16.msra.mxu0 %v4666_v14 }
 0x709   :  { %4671 = vmatprep.subr.bf16.mxu0 %v4670_v45 }
 0x70c   :  { %4673 = vmatpush3.bf16.msra.mxu0 %v4670_v45 }
 0x70d   :  { %4512 = vmatprep.subr.mxu0 %v5033_v37 }
 0x7d2   :  { %v4460_v20 = vpop.f32.mrb[14].mxu0 }
 0x7d3   :  { %v1854_v21 = vadd.f32 %v4460_v20, %v4154_v9  ;;  %v1848_v39 = vpop.f32.mrb[15].mxu0 }
 0x7d4   :  { %v1849_v23 = vadd.f32 %v4154_v9, %v1848_v39 }
 0x7d5   :  { %v1858_v43 = vadd.f32 %v1854_v21, %v5272_v35 }
 0x7d6   :  { %v1857_v41 = vadd.f32 %v1849_v23, %v5268_v33  ;;  %v1903_v33 = vld [vmem:[%s5910_s11] sm:$0xff] }
 0x7d7   :  { %v1864_v42 = vsel %vm156_vm0, %v1858_v43, 0.0  ;;  %v4650_v32 = vpack.c.bf16 %v1904_v31, %v1903_v33 }
 0x7d8   :  { %1865 = vadd.xlane.f32.xlu1 %v1864_v42  ;;  %v1861_v44 = vsel %vm156_vm0, %v1857_v41, 0.0 }
 0x7d9   :  { %1862 = vadd.xlane.f32.xlu0 %v1861_v44  ;;  %4651 = vmatprep.subr.bf16.mxu1 %v4650_v32 }
 0x7da   :  { %4653 = vmatpush3.bf16.msra.mxu1 %v4650_v32  ;;  %v4162_v32 = vld [vmem:[%s5913_s14] ss:$0 sm:$0xff] }
 0x7db   :  { %4655 = vmatprep.subr.bf16.mxu1 %v4654_v47 }
 0x7de   :  { %4657 = vmatpush3.bf16.msra.mxu1 %v4654_v47 }
 0x865   :  { %v1866_v46 = vpop.xlane.xlu1 %1865 }
 0x866   :  { %v1868_v16 = vmul.f32 0.03125, %v1866_v46  ;;  %v1863_v24 = vpop.xlane.xlu0 %1862 }
 0x867   :  { %v1867_v25 = vmul.f32 0.03125, %v1863_v24 }
 0x868   :  { %v1870_v22 = vsub.f32 %v1858_v43, %v1868_v16 }
 0x869   :  { %v1869_v26 = vsub.f32 %v1857_v41, %v1867_v25 }
 0x86a   :  { %v1872_v30 = vmul.f32 %v1870_v22, %v1870_v22 }
 0x86b   :  { %v1871_v28 = vmul.f32 %v1869_v26, %v1869_v26 }
 0x86c   :  { %v1876_v35 = vsel %vm156_vm0, %v1872_v30, 0.0 }
 0x86d   :  { %v1873_v29 = vsel %vm156_vm0, %v1871_v28, 0.0 }
 0x86e   :  { %1874 = vadd.xlane.f32.xlu0 %v1873_v29 }
 0x872   :  { %1877 = vadd.xlane.f32.xlu0 %v1876_v35 }
 0x8fb   :  { %v1875_v49 = vpop.xlane.xlu0 %1874 }
 0x8fc   :  { %v1879_v50 = vmul.f32 0.03125, %v1875_v49 }
 0x8fe   :  { %v1881_v51 = vadd.f32 1e-12, %v1879_v50 }
 0x8ff   :  { %v1878_v52 = vpop.xlane.xlu0 %1877 }
 0x900   :  { %4778 = vrsqrt.f32 %v1881_v51  ;;  %v1880_v36 = vmul.f32 0.03125, %v1878_v52 }
 0x902   :  { %v1882_v53 = vadd.f32 1e-12, %v1880_v36 }
 0x904   :  { %4780 = vrsqrt.f32 %v1882_v53 }
 0x90a   :  { %v4779_v54 = vpop.eup %4778 }
 0x90b   :  { %v1885_v57 = vmul.f32 %v4779_v54, %v1869_v26 }
 0x90d   :  { %v1893_v60 = vmul.f32 %v4157_v56, %v1885_v57 }
 0x90e   :  { %v4781_v61 = vpop.eup %4780 }
 0x90f   :  { %v1886_v62 = vmul.f32 %v4781_v61, %v1870_v22  ;;  %v1901_v63 = vadd.f32 %v4158_v59, %v1893_v60 }
 0x911   :  { %v1894_v0 = vmul.f32 %v4157_v56, %v1886_v62  ;;  %4469 = vmatprep.mubr.msk.f32.mxu1 %vm156_vm0, %v1901_v63 }
 0x913   :  { %v1902_v1 = vadd.f32 %v4158_v59, %v1894_v0 }
 0x915   :  { %4470 = vmatmul.mubr.msk.f32.vlgmr.msra.gmra.mrb[20].mxu1 %vm156_vm0, %v1902_v1 }
 0x9e8   :  { %v4471_v19 = vpop.f32.mrb[20].mxu1 }
 0x9e9   :  { %v1992_v9 = vadd.f32 %v4471_v19, %v4159_v48  ;;  %v1986_v20 = vpop.f32.mrb[21].mxu1 }
 0x9ea   :  { %v1987_v21 = vadd.f32 %v4159_v48, %v1986_v20  ;;  %v4165_v48 = vld [vmem:[%s5914_s15] ss:$0 sm:$0xff] }
 0x9eb   :  { %v1998_v39 = vmul.f32 %v1992_v9, %v1992_v9  ;;  %v1996_v35 = vmul.f32 0.5, %v1992_v9 }
 0x9ec   :  { %v1997_v23 = vmul.f32 %v1987_v21, %v1987_v21  ;;  %v1995_v29 = vmul.f32 0.5, %v1987_v21 }
 0x9ed   :  { %v2000_v43 = vmul.f32 %v1998_v39, %v1992_v9 }
 0x9ee   :  { %v1999_v41 = vmul.f32 %v1997_v23, %v1987_v21 }
 0x9ef   :  { %v2002_v42 = vmul.f32 0.044715, %v2000_v43 }
 0x9f0   :  { %v2001_v44 = vmul.f32 0.044715, %v1999_v41 }
 0x9f1   :  { %v2004_v46 = vadd.f32 %v2002_v42, %v1992_v9  ;;  %v4171_v42 = vld [vmem:[#allocation10 + $0x1] ss:$0 sm:$0xff] }
 0x9f2   :  { %v2003_v16 = vadd.f32 %v2001_v44, %v1987_v21  ;;  %v4166_v21 = vld [vmem:[%s5915_s16] ss:$0 sm:$0xff] }
 0x9f3   :  { %v2006_v24 = vmul.f32 0.7978846, %v2004_v46 }
 0x9f4   :  { %v2005_v25 = vmul.f32 0.7978846, %v2003_v16 }
 0x9f5   :  { %4782 = vtanh.f32 %v2006_v24 }
 0x9f6   :  { %4784 = vtanh.f32 %v2005_v25 }
 0x9ff   :  { %v4783_v22 = vpop.eup %4782 }
 0xa00   :  { %v4785_v26 = vpop.eup %4784  ;;  %v2010_v28 = vadd.f32 1.0, %v4783_v22 }
 0xa01   :  { %v2009_v30 = vadd.f32 1.0, %v4785_v26 }
 0xa02   :  { %v2012_v31 = vmul.f32 %v2010_v28, %v1996_v35 }
 0xa03   :  { %v2011_v33 = vmul.f32 %v2009_v30, %v1995_v29 }
 0xa05   :  { %4488 = vmatprep.mubr.msk.f32.mxu0 %vm2028_vm8, %v2011_v33 }
 0xa06   :  { %4489 = vmatmul.mubr.msk.f32.vlgmr.msra.gmra.mrb[16].mxu0 %vm2028_vm8, %v2012_v31 }
 0xa07   :  { %4514 = vmatprep.mubr.msk.f32.mxu0 %vm5034_vm1, %v5033_v37 }
 0xad9   :  { %v4490_v34 = vpop.f32.mrb[16].mxu0 }
 0xada   :  { %v2107_v40 = vadd.f32 %v4490_v34, %v4162_v32  ;;  %v2101_v47 = vpop.f32.mrb[17].mxu0 }
 0xadb   :  { %v2102_v49 = vadd.f32 %v4162_v32, %v2101_v47 }
 0xadc   :  { %v2111_v50 = vadd.f32 %v2107_v40, %v1902_v1 }
 0xadd   :  { %v2110_v51 = vadd.f32 %v2102_v49, %v1901_v63  ;;  %v4167_v63 = vld [vmem:[%s5904_s5 + $0x20] sm:$0xff] }
 0xade   :  { %v2117_v52 = vsel %vm156_vm0, %v2111_v50, 0.0  ;;  %v4674_v3 = vpack.c.bf16 %v4168_v2, %v4167_v63 }
 0xadf   :  { %2118 = vadd.xlane.f32.xlu1 %v2117_v52  ;;  %v2114_v36 = vsel %vm156_vm0, %v2110_v51, 0.0 }
 0xae0   :  { %2115 = vadd.xlane.f32.xlu0 %v2114_v36  ;;  %4675 = vmatprep.subr.bf16.mxu1 %v4674_v3 }
 0xae1   :  { %4677 = vmatpush3.bf16.msra.mxu1 %v4674_v3 }
 0xae2   :  { %4679 = vmatprep.subr.bf16.mxu1 %v4678_v8 }
 0xae5   :  { %4681 = vmatpush3.bf16.msra.mxu1 %v4678_v8 }
 0xae6   :  { %4502 = vmatprep.subr.mxu1 %v5033_v37 }
 0xb6c   :  { %v2119_v53 = vpop.xlane.xlu1 %2118 }
 0xb6d   :  { %v2121_v54 = vmul.f32 0.03125, %v2119_v53  ;;  %v2116_v56 = vpop.xlane.xlu0 %2115 }
 0xb6e   :  { %v2120_v57 = vmul.f32 0.03125, %v2116_v56 }
 0xb6f   :  { %v2123_v59 = vsub.f32 %v2111_v50, %v2121_v54 }
 0xb70   :  { %v2122_v60 = vsub.f32 %v2110_v51, %v2120_v57 }
 0xb71   :  { %v2125_v61 = vmul.f32 %v2123_v59, %v2123_v59 }
 0xb72   :  { %v2124_v62 = vmul.f32 %v2122_v60, %v2122_v60 }
 0xb73   :  { %v2129_v0 = vsel %vm156_vm0, %v2125_v61, 0.0 }
 0xb74   :  { %2130 = vadd.xlane.f32.xlu1 %v2129_v0  ;;  %v2126_v1 = vsel %vm156_vm0, %v2124_v62, 0.0 }
 0xb75   :  { %2127 = vadd.xlane.f32.xlu0 %v2126_v1 }
 0xc01   :  { %v2131_v10 = vpop.xlane.xlu1 %2130 }
 0xc02   :  { %v2133_v12 = vmul.f32 0.03125, %v2131_v10  ;;  %v2128_v13 = vpop.xlane.xlu0 %2127 }
 0xc03   :  { %v2132_v14 = vmul.f32 0.03125, %v2128_v13 }
 0xc04   :  { %v2135_v15 = vadd.f32 1e-12, %v2133_v12 }
 0xc05   :  { %v2134_v17 = vadd.f32 1e-12, %v2132_v14 }
 0xc06   :  { %4786 = vrsqrt.f32 %v2135_v15 }
 0xc07   :  { %4788 = vrsqrt.f32 %v2134_v17 }
 0xc10   :  { %v4787_v45 = vpop.eup %4786 }
 0xc11   :  { %v4789_v19 = vpop.eup %4788  ;;  %v2139_v9 = vmul.f32 %v4787_v45, %v2123_v59 }
 0xc12   :  { %v2138_v20 = vmul.f32 %v4789_v19, %v2122_v60 }
 0xc13   :  { %v2147_v39 = vmul.f32 %v4165_v48, %v2139_v9 }
 0xc14   :  { %v2146_v23 = vmul.f32 %v4165_v48, %v2138_v20 }
 0xc15   :  { %v5596_v41 = vadd.f32 %v4166_v21, %v2147_v39 }
 0xc16   :  { %v5594_v43 = vadd.f32 %v4166_v21, %v2146_v23 }
 0xc18   :  { %4499 = vmatprep.mubr.msk.f32.mxu1 %vm156_vm0, %v5594_v43 }
 0xc19   :  { %4500 = vmatmul.mubr.msk.f32.vlgmr.msra.gmra.mrb[22].mxu1 %vm156_vm0, %v5596_v41 }
 0xc1a   :  { %4504 = vmatprep.mubr.msk.f32.mxu1 %vm5034_vm1, %v5033_v37 }
 0xcec   :  { %v4501_v44 = vpop.f32.mrb[22].mxu1 }
 0xced   :  { %v5604_v46 = vadd.f32 %v4501_v44, %v4171_v42  ;;  %v2241_v16 = vpop.f32.mrb[23].mxu1 }
 0xcee   :  { %v5606_v24 = vadd.f32 %v4171_v42, %v2241_v16 }
 0xcef   :  { %2254 = vrot.lane.b32.xlu1 %v5604_v46, %s5035_s8 }
 0xcf0   :  { %2252 = vrot.lane.b32.xlu0 %v5606_v24, %s5035_s8 }
 0xcf3   :  { %2256 = vrot.lane.b32.xlu1 %v5606_v24, %s5036_s4 }
 0xcf4   :  { %2260 = vrot.lane.b32.xlu0 %v5606_v24, %s5037_s21 }
 0xcf7   :  { %2258 = vrot.lane.b32.xlu1 %v5604_v46, %s5036_s4 }
 0xcf8   :  { %2264 = vrot.lane.b32.xlu0 %v5606_v24, %s5038_s30 }
 0xcfb   :  { %2262 = vrot.lane.b32.xlu1 %v5604_v46, %s5037_s21 }
 0xcff   :  { %2340 = vrot.lane.b32.xlu1 %v5604_v46, %s5038_s30 }
 0xd61   :  { %v5624_v25 = vpop.permute.xlu1 %2254 }
 0xd62   :  { %2492 = vrot.lane.b32.xlu1 %v5624_v25, %s5038_s30  ;;  %v5628_v22 = vpop.permute.xlu0 %2252 }
 0xd63   :  { %2416 = vrot.lane.b32.xlu0 %v5628_v22, %s5038_s30 }
 0xd65   :  { %v5632_v26 = vpop.permute.xlu1 %2256 }
 0xd66   :  { %v5634_v28 = vpop.permute.xlu0 %2260 }
 0xd67   :  { %2568 = vrot.lane.b32.xlu0 %v5632_v26, %s5038_s30 }
 0xd69   :  { %v5638_v29 = vpop.permute.xlu1 %2258 }
 0xd6a   :  { %2644 = vrot.lane.b32.xlu1 %v5638_v29, %s5038_s30  ;;  %v2265_v30 = vpop.permute.xlu0 %2264 }
 0xd6b   :  { %2720 = vrot.lane.b32.xlu0 %v5634_v28, %s5038_s30  ;;  %4503 = vmatpush3.xpose.msk.msra.mxu1 %vm374_vm2, %v2265_v30 }
 0xd6c   :  { %4507 = vmatprep.subr.mxu1 %v5033_v37 }
 0xd6d   :  { %v5646_v35 = vpop.permute.xlu1 %2262 }
 0xd6e   :  { %2796 = vrot.lane.b32.xlu1 %v5646_v35, %s5038_s30  ;;  %4505 = vmatmul.mubr.msk.f32.vlgmr.msra.gmra.mrb[24].mxu1 %vm374_vm2, %v5606_v24 }
 0xd6f   :  { %4509 = vmatprep.mubr.msk.f32.mxu1 %vm5034_vm1, %v5033_v37 }
 0xd71   :  { %v2341_v33 = vpop.permute.xlu1 %2340 }
 0xd72   :  { %4508 = vmatpush3.xpose.msk.msra.mxu1 %vm374_vm2, %v2341_v33 }
 0xd73   :  { %4517 = vmatprep.subr.mxu1 %v5033_v37 }
 0xd75   :  { %4510 = vmatmul.mubr.msk.f32.vlgmr.msra.gmra.mrb[26].mxu1 %vm374_vm2, %v5604_v46 }
 0xd76   :  { %4519 = vmatprep.mubr.msk.f32.mxu1 %vm5034_vm1, %v5033_v37 }
 0xdd4   :  { %v2493_v31 = vpop.permute.xlu1 %2492 }
 0xdd5   :  { %4518 = vmatpush3.xpose.msk.msra.mxu1 %vm374_vm2, %v2493_v31  ;;  %v2417_v32 = vpop.permute.xlu0 %2416 }
 0xdd6   :  { %4513 = vmatpush3.xpose.msk.msra.mxu0 %vm374_vm2, %v2417_v32  ;;  %4527 = vmatprep.subr.mxu1 %v5033_v37 }
 0xdd7   :  { %4522 = vmatprep.subr.mxu0 %v5033_v37 }
 0xdd8   :  { %4520 = vmatmul.mubr.msk.f32.vlgmr.msra.gmra.mrb[28].mxu1 %vm374_vm2, %v5624_v25 }
 0xdd9   :  { %4515 = vmatmul.mubr.msk.f32.vlgmr.msra.gmra.mrb[18].mxu0 %vm374_vm2, %v5628_v22  ;;  %v2569_v34 = vpop.permute.xlu0 %2568  ;;  %4529 = vmatprep.mubr.msk.f32.mxu1 %vm5034_vm1, %v5033_v37 }
 0xdda   :  { %4523 = vmatpush3.xpose.msk.msra.mxu0 %vm374_vm2, %v2569_v34  ;;  %4524 = vmatprep.mubr.msk.f32.mxu0 %vm5034_vm1, %v5033_v37 }
 0xddb   :  { %4532 = vmatprep.subr.mxu0 %v5033_v37 }
 0xddc   :  { %v2645_v40 = vpop.permute.xlu1 %2644 }
 0xddd   :  { %4525 = vmatmul.mubr.msk.f32.vlgmr.msra.gmra.mrb[20].mxu0 %vm374_vm2, %v5632_v26  ;;  %4528 = vmatpush3.xpose.msk.msra.mxu1 %vm374_vm2, %v2645_v40  ;;  %v2721_v47 = vpop.permute.xlu0 %2720 }
 0xdde   :  { %4533 = vmatpush3.xpose.msk.msra.mxu0 %vm374_vm2, %v2721_v47  ;;  %4534 = vmatprep.mubr.msk.f32.mxu0 %vm5034_vm1, %v5033_v37 }
 0xddf   :  { %4537 = vmatprep.subr.mxu1 %v5033_v37  ;;  %4542 = vmatprep.subr.mxu0 %v5033_v37 }
 0xde0   :  { %v2797_v49 = vpop.permute.xlu1 %2796  ;;  %4530 = vmatmul.mubr.msk.f32.vlgmr.msra.gmra.mrb[30].mxu1 %vm374_vm2, %v5638_v29 }
 0xde1   :  { %4535 = vmatmul.mubr.msk.f32.vlgmr.msra.gmra.mrb[22].mxu0 %vm374_vm2, %v5634_v28  ;;  %4538 = vmatpush3.xpose.msk.msra.mxu1 %vm374_vm2, %v2797_v49 }
 0xde2   :  { %4539 = vmatprep.mubr.msk.f32.mxu1 %vm5034_vm1, %v5033_v37  ;;  %4547 = vmatprep.subr.mxu1 %v5033_v37 }
 0xde3   :  { %4544 = vmatprep.mubr.msk.f32.mxu0 %vm5034_vm1, %v5033_v37 }
 0xde4   :  { %4540 = vmatmul.mubr.msk.f32.vlgmr.msra.gmra.mrb[32].mxu1 %vm374_vm2, %v5646_v35 }
 0xde5   :  { %4549 = vmatprep.mubr.msk.f32.mxu1 %vm5034_vm1, %v5033_v37 }
 0xe41   :  { %v2336_v50 = vpop.f32.mrb[24].mxu1 }
 0xe42   :  { %v2872_v51 = vmul.f32 0.35355338, %v2336_v50  ;;  %v4506_v52 = vpop.f32.mrb[25].mxu1 }
 0xe44   :  { %v2880_v36 = vadd.f32 %v2872_v51, %v5377_v11 }
 0xe46   :  { %v2888_v53 = vsel %vm374_vm2, %v2880_v36, -inf }
 0xe47   :  { %2889 = vmax.xlane.f32.xlu0 %v2888_v53 }
 0xe48   :  { %v2412_v54 = vpop.f32.mrb[26].mxu1 }
 0xe49   :  { %v2873_v56 = vmul.f32 0.35355338, %v2412_v54  ;;  %v4511_v57 = vpop.f32.mrb[27].mxu1 }
 0xe4b   :  { %v2881_v59 = vadd.f32 %v2873_v56, %v5384_v18 }
 0xe4d   :  { %v2891_v60 = vsel %vm374_vm2, %v2881_v59, -inf }
 0xe4e   :  { %2892 = vmax.xlane.f32.xlu1 %v2891_v60 }
 0xeab   :  { %v2564_v61 = vpop.f32.mrb[28].mxu1 }
 0xeac   :  { %v2875_v62 = vmul.f32 0.35355338, %v2564_v61  ;;  %v2488_v0 = vpop.f32.mrb[18].mxu0  ;;  %v4521_v1 = vpop.f32.mrb[29].mxu1 }
 0xead   :  { %v2874_v63 = vmul.f32 0.35355338, %v2488_v0  ;;  %v4516_v2 = vpop.f32.mrb[19].mxu0 }
 0xeae   :  { %v2883_v3 = vadd.f32 %v2875_v62, %v5396_v38 }
 0xeaf   :  { %v2882_v7 = vadd.f32 %v2874_v63, %v5391_v27 }
 0xeb0   :  { %v2640_v11 = vpop.f32.mrb[20].mxu0  ;;  %v2897_v5 = vsel %vm374_vm2, %v2883_v3, -inf }
 0xeb1   :  { %v2876_v8 = vmul.f32 0.35355338, %v2640_v11  ;;  %2898 = vmax.xlane.f32.xlu0 %v2897_v5  ;;  %v4526_v10 = vpop.f32.mrb[21].mxu0  ;;  %v2894_v15 = vsel %vm374_vm2, %v2882_v7, -inf }
 0xeb3   :  { %v2716_v18 = vpop.f32.mrb[30].mxu1  ;;  %v2884_v17 = vadd.f32 %v2876_v8, %v5400_v55 }
 0xeb4   :  { %v2877_v12 = vmul.f32 0.35355338, %v2716_v18  ;;  %v4531_v13 = vpop.f32.mrb[31].mxu1  ;;  %v2792_v14 = vpop.f32.mrb[22].mxu0 }
 0xeb5   :  { %v2878_v45 = vmul.f32 0.35355338, %v2792_v14  ;;  %2895 = vmax.xlane.f32.xlu0 %v2894_v15  ;;  %v4536_v48 = vpop.f32.mrb[23].mxu0  ;;  %v2900_v21 = vsel %vm374_vm2, %v2884_v17, -inf }
 0xeb6   :  { %v2885_v38 = vadd.f32 %v2877_v12, %v5403_v58 }
 0xeb7   :  { %v2868_v19 = vpop.f32.mrb[32].mxu1  ;;  %v2886_v39 = vadd.f32 %v2878_v45, %v5407_v4 }
 0xeb8   :  { %v2879_v9 = vmul.f32 0.35355338, %v2868_v19  ;;  %v4541_v20 = vpop.f32.mrb[33].mxu1  ;;  %v2903_v27 = vsel %vm374_vm2, %v2885_v38, -inf }
 0xeb9   :  { %2904 = vmax.xlane.f32.xlu1 %v2903_v27  ;;  %2901 = vmax.xlane.f32.xlu0 %v2900_v21  ;;  %v2906_v42 = vsel %vm374_vm2, %v2886_v39, -inf }
 0xeba   :  { %v2887_v23 = vadd.f32 %v2879_v9, %v5410_v6 }
 0xebc   :  { %v2909_v55 = vsel %vm374_vm2, %v2887_v23, -inf }
 0xebd   :  { %2910 = vmax.xlane.f32.xlu1 %v2909_v55  ;;  %2907 = vmax.xlane.f32.xlu0 %v2906_v42 }
 0xece   :  { %3052 = vrot.lane.b32.xlu1 %v5604_v46, %s5040_s29 }
 0xed2   :  { %3128 = vrot.lane.b32.xlu1 %v5628_v22, %s5040_s29 }
 0xed3   :  { %2976 = vrot.lane.b32.xlu0 %v5606_v24, %s5040_s29 }
 0xed4   :  { %v2890_v58 = vpop.xlane.xlu0 %2889 }
 0xed5   :  { %v2912_v4 = vsub.f32 %v2880_v36, %v2890_v58 }
 0xed6   :  { %3204 = vrot.lane.b32.xlu1 %v5624_v25, %s5040_s29 }
 0xed7   :  { %3280 = vrot.lane.b32.xlu0 %v5632_v26, %s5040_s29  ;;  %v2920_v6 = vmul.f32 1.442695, %v2912_v4 }
 0xed9   :  { %4790 = vpow2.f32 %v2920_v6 }
 0xeda   :  { %3356 = vrot.lane.b32.xlu1 %v5638_v29, %s5040_s29 }
 0xedb   :  { %v2893_v44 = vpop.xlane.xlu1 %2892 }
 0xedc   :  { %v2913_v46 = vsub.f32 %v2881_v59, %v2893_v44 }
 0xede   :  { %v2922_v16 = vmul.f32 1.442695, %v2913_v46 }
 0xee0   :  { %4792 = vpow2.f32 %v2922_v16 }
 0xee3   :  { %v5724_v22 = vpop.eup %4790 }
 0xee4   :  { %v2936_v24 = vsel %vm374_vm2, %v5724_v22, 0.0 }
 0xeea   :  { %v5728_v25 = vpop.eup %4792 }
 0xeeb   :  { %v2939_v26 = vsel %vm374_vm2, %v5728_v25, 0.0 }
 0xef6   :  { %2937 = vadd.xlane.f32.xlu0 %v2936_v24 }
 0xefe   :  { %2940 = vadd.xlane.f32.xlu1 %v2939_v26 }
 0xf3e   :  { %v2899_v29 = vpop.xlane.xlu0 %2898 }
 0xf3f   :  { %v2915_v30 = vsub.f32 %v2883_v3, %v2899_v29 }
 0xf41   :  { %v2926_v33 = vmul.f32 1.442695, %v2915_v30 }
 0xf42   :  { %v2896_v31 = vpop.xlane.xlu0 %2895 }
 0xf43   :  { %4794 = vpow2.f32 %v2926_v33  ;;  %v2914_v32 = vsub.f32 %v2882_v7, %v2896_v31 }
 0xf45   :  { %v2924_v34 = vmul.f32 1.442695, %v2914_v32 }
 0xf46   :  { %v2905_v40 = vpop.xlane.xlu1 %2904  ;;  %v2902_v47 = vpop.xlane.xlu0 %2901 }
 0xf47   :  { %4796 = vpow2.f32 %v2924_v34  ;;  %v2917_v49 = vsub.f32 %v2885_v38, %v2905_v40  ;;  %v2916_v50 = vsub.f32 %v2884_v17, %v2902_v47  ;;  %v4198_v34 = vld [vmem:[%s5906_s7 + $0x20] sm:$0xff]  ;;  %v4199_v40 = vld [vmem:[%s5906_s7 + $0x28] sm:$0xff] }
 0xf48   :  { %v4682_v47 = vpack.c.bf16 %v4199_v40, %v4198_v34  ;;  %v4207_v40 = vld [vmem:[%s5909_s10 + $0x1] ss:$0 sm:$0xff] }
 0xf49   :  { %v2930_v51 = vmul.f32 1.442695, %v2917_v49  ;;  %v2928_v52 = vmul.f32 1.442695, %v2916_v50  ;;  %v4200_v49 = vld [vmem:[%s5906_s7 + $0x30] sm:$0xff]  ;;  %v4201_v50 = vld [vmem:[%s5906_s7 + $0x38] sm:$0xff] }
 0xf4a   :  { %v2911_v36 = vpop.xlane.xlu1 %2910  ;;  %v2908_v53 = vpop.xlane.xlu0 %2907 }
 0xf4b   :  { %4798 = vpow2.f32 %v2930_v51  ;;  %v2919_v54 = vsub.f32 %v2887_v23, %v2911_v36  ;;  %v2918_v56 = vsub.f32 %v2886_v39, %v2908_v53  ;;  %v4686_v51 = vpack.c.bf16 %v4201_v50, %v4200_v49 }
 0xf4c   :  { %4800 = vpow2.f32 %v2928_v52 }
 0xf4d   :  { %v4795_v57 = vpop.eup %4794  ;;  %v2934_v59 = vmul.f32 1.442695, %v2919_v54  ;;  %v2932_v60 = vmul.f32 1.442695, %v2918_v56 }
 0xf4e   :  { %v3053_v61 = vpop.permute.xlu1 %3052  ;;  %v2977_v62 = vpop.permute.xlu0 %2976  ;;  %v2945_v0 = vsel %vm374_vm2, %v4795_v57, 0.0 }
 0xf4f   :  { %4802 = vpow2.f32 %v2934_v59  ;;  %4548 = vmatpush3.msra.mxu1 %v3053_v61  ;;  %2946 = vadd.xlane.f32.xlu1 %v2945_v0 }
 0xf50   :  { %4804 = vpow2.f32 %v2932_v60  ;;  %4543 = vmatpush3.msra.mxu0 %v2977_v62  ;;  %4557 = vmatprep.subr.mxu1 %v5033_v37 }
 0xf51   :  { %v4797_v1 = vpop.eup %4796  ;;  %4552 = vmatprep.subr.mxu0 %v5033_v37 }
 0xf52   :  { %v2942_v63 = vsel %vm374_vm2, %v4797_v1, 0.0  ;;  %v3129_v12 = vpop.permute.xlu1 %3128  ;;  %v3281_v13 = vpop.permute.xlu0 %3280 }
 0xf53   :  { %2943 = vadd.xlane.f32.xlu0 %v2942_v63 }
 0xf55   :  { %v4799_v2 = vpop.eup %4798 }
 0xf56   :  { %v4801_v3 = vpop.eup %4800  ;;  %v2951_v11 = vsel %vm374_vm2, %v4799_v2, 0.0  ;;  %v3205_v14 = vpop.permute.xlu1 %3204 }
 0xf57   :  { %2952 = vadd.xlane.f32.xlu1 %v2951_v11  ;;  %v2948_v5 = vsel %vm374_vm2, %v4801_v3, 0.0 }
 0xf58   :  { %2949 = vadd.xlane.f32.xlu0 %v2948_v5 }
 0xf59   :  { %v5738_v7 = vpop.eup %4802 }
 0xf5a   :  { %v5740_v8 = vpop.eup %4804  ;;  %v2957_v10 = vsel %vm374_vm2, %v5738_v7, 0.0  ;;  %v3357_v17 = vpop.permute.xlu1 %3356 }
 0xf5b   :  { %2958 = vadd.xlane.f32.xlu1 %v2957_v10  ;;  %v2954_v18 = vsel %vm374_vm2, %v5740_v8, 0.0 }
 0xf5c   :  { %2955 = vadd.xlane.f32.xlu0 %v2954_v18 }
 0xf6c   :  { %3508 = vrot.lane.b32.xlu1 %v5646_v35, %s5040_s29 }
 0xf72   :  { %3432 = vrot.lane.b32.xlu0 %v5634_v28, %s5040_s29 }
 0xf83   :  { %v2938_v15 = vpop.xlane.xlu0 %2937 }
 0xf84   :  { %4806 = vrcp.f32 %v2938_v15  ;;  %v4202_v15 = vld [vmem:[#allocation11 + $0x1] ss:$0 sm:$0xff] }
 0xf8b   :  { %v2941_v45 = vpop.xlane.xlu1 %2940 }
 0xf8c   :  { %4808 = vrcp.f32 %v2941_v45 }
 0xf8e   :  { %v4807_v48 = vpop.eup %4806 }
 0xf8f   :  { %v2961_v38 = vmul.f32 %v4807_v48, %v5724_v22 }
 0xf91   :  { %4545 = vmatmul.mubr.msk.f32.vlgmr.msra.gmra.mrb[24].mxu0 %vm374_vm2, %v2961_v38 }
 0xf92   :  { %4553 = vmatpush3.msra.mxu0 %v3129_v12  ;;  %4554 = vmatprep.mubr.msk.f32.mxu0 %vm5034_vm1, %v5033_v37 }
 0xf93   :  { %4562 = vmatprep.subr.mxu0 %v5033_v37 }
 0xf96   :  { %v4809_v28 = vpop.eup %4808 }
 0xf97   :  { %v2963_v35 = vmul.f32 %v4809_v28, %v5728_v25 }
 0xf99   :  { %4550 = vmatmul.mubr.msk.f32.vlgmr.msra.gmra.mrb[34].mxu1 %vm374_vm2, %v2963_v35 }
 0xf9a   :  { %4558 = vmatpush3.msra.mxu1 %v3205_v14  ;;  %4559 = vmatprep.mubr.msk.f32.mxu1 %vm5034_vm1, %v5033_v37 }
 0xf9b   :  { %4567 = vmatprep.subr.mxu1 %v5033_v37 }
 0xfdc   :  { %v2947_v19 = vpop.xlane.xlu1 %2946 }
 0xfdd   :  { %4810 = vrcp.f32 %v2947_v19 }
 0xfe0   :  { %v2944_v9 = vpop.xlane.xlu0 %2943 }
 0xfe1   :  { %4812 = vrcp.f32 %v2944_v9 }
 0xfe4   :  { %v2953_v20 = vpop.xlane.xlu1 %2952 }
 0xfe5   :  { %4814 = vrcp.f32 %v2953_v20  ;;  %v2950_v27 = vpop.xlane.xlu0 %2949 }
 0xfe6   :  { %4816 = vrcp.f32 %v2950_v27 }
 0xfe7   :  { %v4811_v21 = vpop.eup %4810 }
 0xfe8   :  { %v2967_v39 = vmul.f32 %v4811_v21, %v4795_v57  ;;  %v2959_v23 = vpop.xlane.xlu1 %2958 }
 0xfe9   :  { %4818 = vrcp.f32 %v2959_v23  ;;  %v2956_v55 = vpop.xlane.xlu0 %2955 }
 0xfea   :  { %4820 = vrcp.f32 %v2956_v55  ;;  %4560 = vmatmul.mubr.msk.f32.vlgmr.msra.gmra.mrb[36].mxu1 %vm374_vm2, %v2967_v39 }
 0xfeb   :  { %v4813_v42 = vpop.eup %4812  ;;  %4568 = vmatpush3.msra.mxu1 %v3357_v17  ;;  %4569 = vmatprep.mubr.msk.f32.mxu1 %vm5034_vm1, %v5033_v37 }
 0xfec   :  { %v2965_v58 = vmul.f32 %v4813_v42, %v4797_v1  ;;  %4577 = vmatprep.subr.mxu1 %v5033_v37  ;;  %v3509_v16 = vpop.permute.xlu1 %3508 }
 0xfed   :  { %v3433_v24 = vpop.permute.xlu0 %3432 }
 0xfee   :  { %4555 = vmatmul.mubr.msk.f32.vlgmr.msra.gmra.mrb[26].mxu0 %vm374_vm2, %v2965_v58 }
 0xfef   :  { %v4815_v4 = vpop.eup %4814  ;;  %4563 = vmatpush3.msra.mxu0 %v3281_v13  ;;  %4564 = vmatprep.mubr.msk.f32.mxu0 %vm5034_vm1, %v5033_v37 }
 0xff0   :  { %v4817_v6 = vpop.eup %4816  ;;  %v2971_v44 = vmul.f32 %v4815_v4, %v4799_v2  ;;  %4572 = vmatprep.subr.mxu0 %v5033_v37 }
 0xff1   :  { %v2969_v46 = vmul.f32 %v4817_v6, %v4801_v3  ;;  %v4209_v6 = vld [vmem:[%s5910_s11 + $0x28] sm:$0xff] }
 0xff2   :  { %4570 = vmatmul.mubr.msk.f32.vlgmr.msra.gmra.mrb[38].mxu1 %vm374_vm2, %v2971_v44 }
 0xff3   :  { %v4819_v22 = vpop.eup %4818  ;;  %4565 = vmatmul.mubr.msk.f32.vlgmr.msra.gmra.mrb[28].mxu0 %vm374_vm2, %v2969_v46  ;;  %4578 = vmatpush3.msra.mxu1 %v3509_v16  ;;  %v4210_v46 = vld [vmem:[%s5910_s11 + $0x30] sm:$0xff]  ;;  %v4211_v16 = vld [vmem:[%s5910_s11 + $0x38] sm:$0xff] }
 0xff4   :  { %v4821_v25 = vpop.eup %4820  ;;  %v2975_v26 = vmul.f32 %v4819_v22, %v5738_v7  ;;  %4573 = vmatpush3.msra.mxu0 %v3433_v24  ;;  %4574 = vmatprep.mubr.msk.f32.mxu0 %vm5034_vm1, %v5033_v37  ;;  %v4694_v22 = vpack.c.bf16 %v4211_v16, %v4210_v46 }
 0xff5   :  { %v2973_v29 = vmul.f32 %v4821_v25, %v5740_v8  ;;  %4579 = vmatprep.mubr.msk.f32.mxu1 %vm5034_vm1, %v5033_v37  ;;  %4683 = vmatprep.subr.bf16.mxu0 %v4682_v47 }
 0xff6   :  { %4580 = vmatmul.mubr.msk.f32.vlgmr.msra.gmra.mrb[40].mxu1 %vm374_vm2, %v2975_v26 }
 0xff7   :  { %4575 = vmatmul.mubr.msk.f32.vlgmr.msra.gmra.mrb[30].mxu0 %vm374_vm2, %v2973_v29 }
 0xff8   :  { %4685 = vmatpush3.bf16.msra.mxu0 %v4682_v47 }
 0xff9   :  { %4687 = vmatprep.subr.bf16.mxu0 %v4686_v51 }
 0xffc   :  { %4689 = vmatpush3.bf16.msra.mxu0 %v4686_v51 }
0x1064   :  { %v3048_v30 = vpop.f32.mrb[24].mxu0 }
0x1065   :  { %v4546_v33 = vpop.f32.mrb[25].mxu0 }
0x106c   :  { %v3124_v31 = vpop.f32.mrb[34].mxu1 }
0x106d   :  { %v4551_v32 = vpop.f32.mrb[35].mxu1 }
0x106e   :  { %v4206_v32 = vld [vmem:[#allocation13 + $0x1] ss:$0 sm:$0xff] }
0x10bd   :  { %v3276_v52 = vpop.f32.mrb[36].mxu1 }
0x10be   :  { %3588 = vrot.lane.b32.xlu1 %v3276_v52, %s5029_s28  ;;  %v4561_v36 = vpop.f32.mrb[37].mxu1 }
0x10c1   :  { %v3200_v53 = vpop.f32.mrb[26].mxu0 }
0x10c2   :  { %3586 = vrot.lane.b32.xlu0 %v3200_v53, %s5029_s28  ;;  %v4556_v54 = vpop.f32.mrb[27].mxu0  ;;  %v4216_v53 = vld [vmem:[%s5912_s13 + $0x40] sm:$0xff] }
0x10c3   :  { %v4217_v54 = vld [vmem:[%s5912_s13 + $0x48] sm:$0xff] }
0x10c5   :  { %v3428_v56 = vpop.f32.mrb[38].mxu1 }
0x10c6   :  { %v3352_v57 = vpop.f32.mrb[28].mxu0  ;;  %3596 = vrot.lane.b32.xlu1 %v3428_v56, %s5936_s23  ;;  %v4571_v59 = vpop.f32.mrb[39].mxu1  ;;  %v4698_v56 = vpack.c.bf16 %v4217_v54, %v4216_v53 }
0x10c7   :  { %3594 = vrot.lane.b32.xlu0 %v3352_v57, %s5936_s23  ;;  %v4566_v60 = vpop.f32.mrb[29].mxu0  ;;  %v4218_v57 = vld [vmem:[%s5912_s13 + $0x50] sm:$0xff]  ;;  %v4219_v59 = vld [vmem:[%s5912_s13 + $0x58] sm:$0xff] }
0x10c8   :  { %4699 = vmatprep.subr.bf16.mxu0 %v4698_v56  ;;  %v4220_v60 = vld [vmem:[%s5912_s13 + $0x60] sm:$0xff] }
0x10c9   :  { %v3580_v61 = vpop.f32.mrb[40].mxu1 }
0x10ca   :  { %v3504_v62 = vpop.f32.mrb[30].mxu0  ;;  %3604 = vrot.lane.b32.xlu1 %v3580_v61, %s5041_s0  ;;  %v4581_v0 = vpop.f32.mrb[41].mxu1  ;;  %v4221_v61 = vld [vmem:[%s5912_s13 + $0x68] sm:$0xff] }
0x10cb   :  { %3602 = vrot.lane.b32.xlu0 %v3504_v62, %s5041_s0  ;;  %v4576_v1 = vpop.f32.mrb[31].mxu0  ;;  %v4706_v62 = vpack.c.bf16 %v4221_v61, %v4220_v60  ;;  %v4222_v0 = vld [vmem:[%s5912_s13 + $0x70] sm:$0xff] }
0x10cc   :  { %v4223_v1 = vld [vmem:[%s5912_s13 + $0x78] sm:$0xff] }
0x1130   :  { %v3589_v63 = vpop.permute.xlu1 %3588 }
0x1131   :  { %v3609_v5 = vsel %vm374_vm2, %v3124_v31, %v3589_v63  ;;  %v4710_v63 = vpack.c.bf16 %v4223_v1, %v4222_v0 }
0x1134   :  { %v3587_v2 = vpop.permute.xlu0 %3586 }
0x1135   :  { %v3608_v7 = vsel %vm374_vm2, %v3048_v30, %v3587_v2  ;;  %v4213_v2 = vld [vmem:[%s5911_s12 + $0x1] ss:$0 sm:$0xff] }
0x1138   :  { %v3597_v3 = vpop.permute.xlu1 %3596 }
0x1139   :  { %v3595_v11 = vpop.permute.xlu0 %3594  ;;  %v3611_v8 = vsel %vm1759_vm6, %v3609_v5, %v3597_v3 }
0x113a   :  { %v3610_v18 = vsel %vm1759_vm6, %v3608_v7, %v3595_v11 }
0x113c   :  { %v3605_v10 = vpop.permute.xlu1 %3604 }
0x113d   :  { %v3613_v12 = vsel %vm1762_vm7, %v3611_v8, %v3605_v10  ;;  %v3603_v13 = vpop.permute.xlu0 %3602 }
0x113e   :  { %v3612_v14 = vsel %vm1762_vm7, %v3610_v18, %v3603_v13 }
0x113f   :  { %4590 = vmatprep.mubr.msk.f32.mxu0 %vm156_vm0, %v3612_v14 }
0x1140   :  { %4591 = vmatmul.mubr.msk.f32.vlgmr.msra.gmra.mrb[32].mxu0 %vm156_vm0, %v3613_v12 }
0x1141   :  { %4701 = vmatpush3.bf16.msra.mxu0 %v4698_v56 }
0x1213   :  { %v4592_v17 = vpop.f32.mrb[32].mxu0 }
0x1214   :  { %v3705_v45 = vadd.f32 %v4592_v17, %v4202_v15  ;;  %v3699_v48 = vpop.f32.mrb[33].mxu0 }
0x1215   :  { %v3700_v38 = vadd.f32 %v4202_v15, %v3699_v48 }
0x1216   :  { %v3709_v28 = vadd.f32 %v3705_v45, %v5596_v41 }
0x1217   :  { %v3708_v35 = vadd.f32 %v3700_v38, %v5594_v43  ;;  %v4208_v43 = vld [vmem:[%s5910_s11 + $0x20] sm:$0xff] }
0x1218   :  { %v3717_v19 = vsel %vm156_vm0, %v3709_v28, 0.0  ;;  %v4690_v44 = vpack.c.bf16 %v4209_v6, %v4208_v43 }
0x1219   :  { %3718 = vadd.xlane.f32.xlu1 %v3717_v19  ;;  %v3714_v9 = vsel %vm156_vm0, %v3708_v35, 0.0 }
0x121a   :  { %3715 = vadd.xlane.f32.xlu0 %v3714_v9  ;;  %4691 = vmatprep.subr.bf16.mxu1 %v4690_v44 }
0x121b   :  { %4693 = vmatpush3.bf16.msra.mxu1 %v4690_v44 }
0x121c   :  { %4695 = vmatprep.subr.bf16.mxu1 %v4694_v22 }
0x121f   :  { %4697 = vmatpush3.bf16.msra.mxu1 %v4694_v22 }
0x12a6   :  { %v3719_v20 = vpop.xlane.xlu1 %3718 }
0x12a7   :  { %v3721_v27 = vmul.f32 0.03125, %v3719_v20  ;;  %v3716_v21 = vpop.xlane.xlu0 %3715 }
0x12a8   :  { %v3720_v39 = vmul.f32 0.03125, %v3716_v21 }
0x12a9   :  { %v3723_v23 = vsub.f32 %v3709_v28, %v3721_v27 }
0x12aa   :  { %v3722_v55 = vsub.f32 %v3708_v35, %v3720_v39  ;;  %v4225_v39 = vld [vmem:[%s5913_s14 + $0x1] ss:$0 sm:$0xff] }
0x12ab   :  { %v3725_v4 = vmul.f32 %v3723_v23, %v3723_v23 }
0x12ac   :  { %v3724_v42 = vmul.f32 %v3722_v55, %v3722_v55 }
0x12ad   :  { %v3729_v41 = vsel %vm156_vm0, %v3725_v4, 0.0 }
0x12ae   :  { %v3726_v58 = vsel %vm156_vm0, %v3724_v42, 0.0 }
0x12af   :  { %3727 = vadd.xlane.f32.xlu0 %v3726_v58 }
0x12b3   :  { %3730 = vadd.xlane.f32.xlu0 %v3729_v41 }
0x133c   :  { %v3728_v24 = vpop.xlane.xlu0 %3727 }
0x133d   :  { %v3732_v25 = vmul.f32 0.03125, %v3728_v24 }
0x133f   :  { %v3734_v26 = vadd.f32 1e-12, %v3732_v25 }
0x1340   :  { %v3731_v29 = vpop.xlane.xlu0 %3730 }
0x1341   :  { %4822 = vrsqrt.f32 %v3734_v26  ;;  %v3733_v30 = vmul.f32 0.03125, %v3731_v29 }
0x1343   :  { %v3735_v33 = vadd.f32 1e-12, %v3733_v30 }
0x1345   :  { %4824 = vrsqrt.f32 %v3735_v33 }
0x134b   :  { %v4823_v31 = vpop.eup %4822 }
0x134c   :  { %v3738_v34 = vmul.f32 %v4823_v31, %v3722_v55  ;;  %v4014_v31 = vld [vmem:[%s5916_s17] sm:$0xff] }
0x134e   :  { %v3746_v47 = vmul.f32 %v4206_v32, %v3738_v34 }
0x134f   :  { %v4825_v49 = vpop.eup %4824 }
0x1350   :  { %v3739_v50 = vmul.f32 %v4825_v49, %v3723_v23  ;;  %v3754_v51 = vadd.f32 %v4207_v40, %v3746_v47  ;;  %v4017_v47 = vld [vmem:[%s5916_s17 + $0x18] sm:$0xff]  ;;  %v5042_v49 = vmov 0.0|0.0  }
0x1351   :  { %4714 = vmatprep.subr.bf16.mxu1 %v5042_v49 }
0x1352   :  { %v3747_v52 = vmul.f32 %v4206_v32, %v3739_v50  ;;  %4601 = vmatprep.mubr.msk.f32.mxu1 %vm156_vm0, %v3754_v51  ;;  %v4015_v32 = vld [vmem:[%s5916_s17 + $0x8] sm:$0xff] }
0x1353   :  { %v4715_v34 = vpack.c.bf16 %v4015_v32, %v4014_v31 }
0x1354   :  { %v3755_v36 = vadd.f32 %v4207_v40, %v3747_v52  ;;  %v4016_v40 = vld [vmem:[%s5916_s17 + $0x10] sm:$0xff] }
0x1355   :  { %v4718_v50 = vpack.c.bf16 %v4017_v47, %v4016_v40 }
0x1356   :  { %4602 = vmatmul.mubr.msk.f32.vlgmr.msra.gmra.mrb[42].mxu1 %vm156_vm0, %v3755_v36 }
0x1357   :  { %4631 = vmatprep.mubr.msk.f32.mxu1 %vm5034_vm1, %v5033_v37  ;;  %v4702_v37 = vpack.c.bf16 %v4219_v59, %v4218_v57  ;;  %4716 = vmatpush3.bf16.msra.mxu1 %v4715_v34  ;;  %v4230_v59 = vld [vmem:[%s5914_s15 + $0x1] ss:$0 sm:$0xff]  ;;  %s5043_s15 = smov [#allocation14]  }
0x1358   :  { %4717 = vmatprep.subr.bf16.mxu1 %v5042_v49 }
0x1359   :  { %4703 = vmatprep.subr.bf16.mxu0 %v4702_v37 }
0x135a   :  { %4705 = vmatpush3.bf16.msra.mxu0 %v4702_v37 }
0x135b   :  { %4707 = vmatprep.subr.bf16.mxu0 %v4706_v62  ;;  %4719 = vmatpush3.bf16.msra.mxu1 %v4718_v50 }
0x135e   :  { %4709 = vmatpush3.bf16.msra.mxu0 %v4706_v62  ;;  %v4231_v62 = vld [vmem:[%s5915_s16 + $0x1] ss:$0 sm:$0xff]  ;;  %s4113_s16 = sshll.u32 %s5043_s15, 4  ;;  %s4114_s16 = int_to_ptr.vmem [resolvable:$true] %s4113_s16 }
0x135f   :  { %4711 = vmatprep.subr.bf16.mxu0 %v4710_v63  ;;  %s4990_s8 = scalar_lea.vmem %s4114_s16, 32  ;;  %p4995_p1 = scmp.lt.s32.totalorder %s4114_s16, %s4114_s16 }
0x1360   :  { %p4991_p0 = scmp.ne.s32.totalorder %s4114_s16, %s4990_s8  ;;  %p4996_p2 = scmp.lt.s32.totalorder %s4990_s8, %s4990_s8 }
0x1362   :  { %4713 = vmatpush3.bf16.msra.mxu0 %v4710_v63  ;;  %p4997_p3 = por %p4996_p2, %p4995_p1 }
0x1364   :  { %p4998_p4 = pnand %p4997_p3, %p4991_p0 }
0x1429   :  { %v4603_v3 = vpop.f32.mrb[42].mxu1 }
0x142a   :  { %v3847_v11 = vadd.f32 %v4603_v3, %v4213_v2  ;;  %v3841_v5 = vpop.f32.mrb[43].mxu1 }
0x142b   :  { %v3842_v7 = vadd.f32 %v4213_v2, %v3841_v5  ;;  %v4232_v5 = vld [vmem:[%s5917_s18] ss:$0 sm:$0xff] }
0x142c   :  { %v3853_v8 = vmul.f32 %v3847_v11, %v3847_v11  ;;  %v3851_v20 = vmul.f32 0.5, %v3847_v11 }
0x142d   :  { %v3852_v10 = vmul.f32 %v3842_v7, %v3842_v7  ;;  %v3850_v19 = vmul.f32 0.5, %v3842_v7 }
0x142e   :  { %v3855_v18 = vmul.f32 %v3853_v8, %v3847_v11 }
0x142f   :  { %v3854_v12 = vmul.f32 %v3852_v10, %v3842_v7 }
0x1430   :  { %v3857_v13 = vmul.f32 0.044715, %v3855_v18  ;;  %v4103_v18 = vld [vmem:[#allocation5] sm:$0x3] }
0x1431   :  { %v3856_v14 = vmul.f32 0.044715, %v3854_v12 }
0x1432   :  { %v3859_v15 = vadd.f32 %v3857_v13, %v3847_v11 }
0x1433   :  { %v3858_v17 = vadd.f32 %v3856_v14, %v3842_v7 }
0x1434   :  { %v3861_v45 = vmul.f32 0.7978846, %v3859_v15 }
0x1435   :  { %v3860_v48 = vmul.f32 0.7978846, %v3858_v17 }
0x1436   :  { %4826 = vtanh.f32 %v3861_v45 }
0x1437   :  { %4828 = vtanh.f32 %v3860_v48 }
0x1440   :  { %v4827_v38 = vpop.eup %4826 }
0x1441   :  { %v4829_v28 = vpop.eup %4828  ;;  %v3865_v35 = vadd.f32 1.0, %v4827_v38 }
0x1442   :  { %v3864_v9 = vadd.f32 1.0, %v4829_v28 }
0x1443   :  { %v3867_v21 = vmul.f32 %v3865_v35, %v3851_v20 }
0x1444   :  { %v3866_v27 = vmul.f32 %v3864_v9, %v3850_v19 }
0x1446   :  { %4620 = vmatprep.mubr.msk.f32.mxu0 %vm2028_vm8, %v3866_v27 }
0x1447   :  { %4621 = vmatmul.mubr.msk.f32.vlgmr.msra.gmra.mrb[34].mxu0 %vm2028_vm8, %v3867_v21 }
0x151a   :  { %v4622_v23 = vpop.f32.mrb[34].mxu0 }
0x151b   :  { %v3963_v55 = vadd.f32 %v4622_v23, %v4225_v39  ;;  %v3957_v42 = vpop.f32.mrb[35].mxu0 }
0x151c   :  { %v3958_v58 = vadd.f32 %v4225_v39, %v3957_v42 }
0x151d   :  { %v3967_v4 = vadd.f32 %v3963_v55, %v3755_v36 }
0x151e   :  { %v3966_v41 = vadd.f32 %v3958_v58, %v3754_v51 }
0x151f   :  { %v3975_v43 = vsel %vm156_vm0, %v3967_v4, 0.0 }
0x1520   :  { %3976 = vadd.xlane.f32.xlu0 %v3975_v43  ;;  %v3972_v6 = vsel %vm156_vm0, %v3966_v41, 0.0 }
0x1521   :  { %3973 = vadd.xlane.f32.xlu1 %v3972_v6 }
0x15ad   :  { %v3977_v44 = vpop.xlane.xlu0 %3976 }
0x15ae   :  { %v3979_v46 = vmul.f32 0.03125, %v3977_v44  ;;  %v3974_v16 = vpop.xlane.xlu1 %3973 }
0x15af   :  { %v3978_v22 = vmul.f32 0.03125, %v3974_v16 }
0x15b0   :  { %v3981_v24 = vsub.f32 %v3967_v4, %v3979_v46 }
0x15b1   :  { %v3980_v25 = vsub.f32 %v3966_v41, %v3978_v22 }
0x15b2   :  { %v3983_v26 = vmul.f32 %v3981_v24, %v3981_v24 }
0x15b3   :  { %v3982_v29 = vmul.f32 %v3980_v25, %v3980_v25 }
0x15b4   :  { %v3987_v30 = vsel %vm156_vm0, %v3983_v26, 0.0 }
0x15b5   :  { %3988 = vadd.xlane.f32.xlu0 %v3987_v30  ;;  %v3984_v33 = vsel %vm156_vm0, %v3982_v29, 0.0 }
0x15b6   :  { %3985 = vadd.xlane.f32.xlu1 %v3984_v33 }
0x1642   :  { %v3989_v51 = vpop.xlane.xlu0 %3988 }
0x1643   :  { %v3991_v52 = vmul.f32 0.03125, %v3989_v51  ;;  %v3986_v36 = vpop.xlane.xlu1 %3985 }
0x1644   :  { %v3990_v53 = vmul.f32 0.03125, %v3986_v36 }
0x1645   :  { %v3993_v54 = vadd.f32 1e-12, %v3991_v52 }
0x1646   :  { %v3992_v56 = vadd.f32 1e-12, %v3990_v53 }
0x1647   :  { %4830 = vrsqrt.f32 %v3993_v54 }
0x1648   :  { %4832 = vrsqrt.f32 %v3992_v56 }
0x1651   :  { %v4831_v57 = vpop.eup %4830 }
0x1652   :  { %v4833_v37 = vpop.eup %4832  ;;  %v3997_v60 = vmul.f32 %v4831_v57, %v3981_v24 }
0x1653   :  { %v3996_v61 = vmul.f32 %v4833_v37, %v3980_v25 }
0x1654   :  { %v4005_v0 = vmul.f32 %v4230_v59, %v3997_v60 }
0x1655   :  { %v4004_v1 = vmul.f32 %v4230_v59, %v3996_v61 }
0x1656   :  { %v4013_v63 = vadd.f32 %v4231_v62, %v4005_v0 }
0x1657   :  { %v4012_v2 = vadd.f32 %v4231_v62, %v4004_v1 }
0x1658   :  { %v4027_v3 = vrot.slane %v4013_v63, 7 }
0x165a   :  { %v4029_v11 = vsel %vm4028_vm9, %v4027_v3, %v4012_v2 }
0x165b   :  { %4632 = vmatmul.mubr.msk.f32.vlgmr.msra.gmra.mrb[44].mxu1 %vm156_vm0, %v4029_v11 }
0x172e   :  { %v4098_v7 = vpop.f32.mrb[44].mxu1 }
0x172f   :  { %v4099_v8 = vadd.f32 %v4232_v5, %v4098_v7  ;;  %v4633_v10 = vpop.f32.mrb[45].mxu1 }
0x1731   :  { %4834 = vtanh.f32 %v4099_v8 }
0x173b   :  { %v4835_v12 = vpop.eup %4834 }
0x173c   :  { %v4104_v13 = vmul.f32 %v4835_v12, %v4103_v18 }
0x173e   :  { %4106 = vst.msk [vmem:[#allocation14] sm:$0x3] %vm4105_vm10, %v4104_v13 }
0x173f   :  { %5001 = shalt.err (!%p4998_p4)
}
0x1740   :  { %s5938_s21 = sld [smem:[#allocation24_spill]] }
0x1746   :  { %s5002_s30 = scalar_lea.hbm %s5938_s21, 32 }
0x1747   :  { %p5003_p5 = scmp.ne.s32.totalorder %s5938_s21, %s5002_s30  ;;  %p5006_p6 = scmp.lt.u32.totalorder %s5002_s30, %s5938_s21 }
0x1749   :  { %p5008_p7 = pnand %p5006_p6, %p5003_p5 }
0x174b   :  { %5011 = shalt.err (!%p5008_p7)
}
0x174c   :  { %4116 = dma.vmem_to_hbm [thread:$0]  %s4114_s16, 32, %s5938_s21, [#allocation4]  }
0x174d   :  { %5020 = dma.done.wait [#allocation4], 32  }
0x174e   :  { %5021 = vsyncadd [#allocation4], 4294967264 }
0x174f   :  { %4120 = vsyncpa [#allocation3], 1 }
0x1750   :  { %4121 = vsyncpa [#allocation6], 1 }
0x1751   :  { %4122 = vsyncpa [#allocation9], 1 }
0x1752   :  { %4123 = vsyncpa [#allocation12], 1 }
0x1753   :  { %4124 = vsyncpa [#allocation4], 1 }

</bundles_post_ra>
